<compile_context>
chip_gen: v5e
topology: v5e:2x2
jax: 0.10.0
libtpu: 0.0.40
codegen_flags: <defaults>
</compile_context>

<pallas_src>
import math

import jax
import jax.numpy as jnp
from jax.experimental import pallas as pl
from jax.experimental.pallas import tpu as pltpu

DIM = 32
NUM_HEADS = 8
HEAD_DIM = DIM // NUM_HEADS


def _mha_kernel(x_ref, wq_ref, wk_ref, wv_ref, bq_ref, bk_ref, bv_ref,
                wo_ref, bo_ref, val_ref, attn_ref, ctx_ref):
    Bt, N, C = x_ref.shape

    # Flatten the batch tile: one large-M in-projection per q/k/v.
    x2 = x_ref[...].reshape(Bt * N, C).astype(jnp.float32)

    # Weights already transposed (C, C) on host; scale folded into W_q / b_q.
    q = jnp.dot(x2, wq_ref[...], preferred_element_type=jnp.float32) + bq_ref[...]
    k = jnp.dot(x2, wk_ref[...], preferred_element_type=jnp.float32) + bk_ref[...]
    v = jnp.dot(x2, wv_ref[...], preferred_element_type=jnp.float32) + bv_ref[...]

    q3 = q.reshape(Bt, N, C)
    k3 = k.reshape(Bt, N, C)
    v3 = v.reshape(Bt, N, C)

    attn_sum = jnp.zeros((Bt, N, N), jnp.float32)
    for h in range(NUM_HEADS):  # static unroll (small N / small head count)
        lo = h * HEAD_DIM
        qh = q3[:, :, lo:lo + HEAD_DIM]                       # (Bt, N, hd)
        kh = k3[:, :, lo:lo + HEAD_DIM]                       # (Bt, N, hd)
        vh = v3[:, :, lo:lo + HEAD_DIM]                       # (Bt, N, hd)

        # Batched (over the Bt batch tile) scaled-dot-product attention.
        s = jnp.einsum("bnd,bmd->bnm", qh, kh,
                       preferred_element_type=jnp.float32)    # (Bt, N, N)
        s = s - jnp.max(s, axis=-1, keepdims=True)
        e = jnp.exp(s)
        p = e * pl.reciprocal(jnp.sum(e, axis=-1, keepdims=True), approx=True)
        attn_sum = attn_sum + p

        oh = jnp.einsum("bnm,bmd->bnd", p, vh,
                        preferred_element_type=jnp.float32)   # (Bt, N, hd)
        # Per-head context goes into the VMEM scratch accumulator (no concat).
        ctx_ref[:, lo:lo + HEAD_DIM] = oh.reshape(Bt * N, HEAD_DIM)

    # Output projection: single (Bt*N, C) @ (C, C) matmul.
    value = jnp.dot(ctx_ref[...], wo_ref[...],
                    preferred_element_type=jnp.float32) + bo_ref[...]
    val_ref[...] = value.reshape(Bt, N, C).astype(val_ref.dtype)
    attn_ref[...] = (attn_sum * (1.0 / NUM_HEADS)).astype(attn_ref.dtype)


def _pick_batch_tile(B, N, target_rows=256):
    """Largest divisor Bt of B such that Bt*N ~ target_rows (MXU-friendly)."""
    want = max(1, min(B, -(-target_rows // N)))
    for bt in range(want, 0, -1):
        if B % bt == 0:
            return bt
    return 1


def attention_forward(x, w_in, b_in, w_out, b_out):
    """x: (B, N, C).  Returns (value (B,N,C), attn (B,N,N))."""
    B, N, C = x.shape
    scale = 1.0 / math.sqrt(HEAD_DIM)

    # Host-side weight prep: split qkv, pre-transpose, fold the Q scale.
    w_q = (w_in[:C].T * scale).astype(x.dtype)          # (C, C)
    w_k = w_in[C:2 * C].T.astype(x.dtype)               # (C, C)
    w_v = w_in[2 * C:].T.astype(x.dtype)                # (C, C)
    b_q = (b_in[:C] * scale).reshape(1, C).astype(x.dtype)
    b_k = b_in[C:2 * C].reshape(1, C).astype(x.dtype)
    b_v = b_in[2 * C:].reshape(1, C).astype(x.dtype)
    w_o = w_out.T.astype(x.dtype)                       # (C, C)
    b_o = b_out.reshape(1, C).astype(x.dtype)

    Bt = _pick_batch_tile(B, N)
    grid = (B // Bt,)

    wspec = pl.BlockSpec((C, C), lambda b: (0, 0))
    bspec = pl.BlockSpec((1, C), lambda b: (0, 0))

    return pl.pallas_call(
        _mha_kernel,
        out_shape=(
            jax.ShapeDtypeStruct((B, N, C), x.dtype),
            jax.ShapeDtypeStruct((B, N, N), x.dtype),
        ),
        grid_spec=pltpu.PrefetchScalarGridSpec(
            num_scalar_prefetch=0,
            grid=grid,
            in_specs=[
                pl.BlockSpec((Bt, N, C), lambda b: (b, 0, 0)),   # x tile
                wspec, wspec, wspec,                             # W_q, W_k, W_v
                bspec, bspec, bspec,                             # b_q, b_k, b_v
                wspec,                                           # W_out^T
                bspec,                                           # b_out
            ],
            out_specs=[
                pl.BlockSpec((Bt, N, C), lambda b: (b, 0, 0)),   # value
                pl.BlockSpec((Bt, N, N), lambda b: (b, 0, 0)),   # attn weights
            ],
            scratch_shapes=[pltpu.VMEM((Bt * N, C), jnp.float32)],
        ),
        compiler_params=pltpu.CompilerParams(
            dimension_semantics=("parallel",)),
    )(x, w_q, w_k, w_v, b_q, b_k, b_v, w_o, b_o)


def _reference(x, w_in, b_in, w_out, b_out):
    """Pure-JAX mirror of torch.nn.MultiheadAttention (batch_first, no mask)."""
    B, N, C = x.shape
    qkv = jnp.einsum("bnc,dc->bnd", x, w_in) + b_in          # (B, N, 3C)
    q, k, v = jnp.split(qkv, 3, axis=-1)
    q = q.reshape(B, N, NUM_HEADS, HEAD_DIM).transpose(0, 2, 1, 3)
    k = k.reshape(B, N, NUM_HEADS, HEAD_DIM).transpose(0, 2, 1, 3)
    v = v.reshape(B, N, NUM_HEADS, HEAD_DIM).transpose(0, 2, 1, 3)
    q = q * (1.0 / math.sqrt(HEAD_DIM))
    s = jnp.einsum("bhqd,bhkd->bhqk", q, k)
    p = jax.nn.softmax(s, axis=-1)                           # (B, H, N, N)
    o = jnp.einsum("bhqk,bhkd->bhqd", p, v)
    o = o.transpose(0, 2, 1, 3).reshape(B, N, C)
    value = jnp.einsum("bnc,dc->bnd", o, w_out) + b_out
    attn = jnp.mean(p, axis=1)                               # average over heads
    return value, attn


if __name__ == "__main__":
    B, N = 2, 8
    key = jax.random.PRNGKey(0)
    k1, k2, k3, k4, k5 = jax.random.split(key, 5)

    x = jax.random.normal(k1, (B, N, DIM), jnp.float32)
    # Shapes match nn.MultiheadAttention(dim, heads):
    w_in = jax.random.normal(k2, (3 * DIM, DIM), jnp.float32) * 0.1   # in_proj_weight
    b_in = jax.random.normal(k3, (3 * DIM,), jnp.float32) * 0.1       # in_proj_bias
    w_out = jax.random.normal(k4, (DIM, DIM), jnp.float32) * 0.1      # out_proj.weight
    b_out = jax.random.normal(k5, (DIM,), jnp.float32) * 0.1          # out_proj.bias

    value, attn = attention_forward(x, w_in, b_in, w_out, b_out)
    jax.block_until_ready((value, attn))

    ref_value, ref_attn = _reference(x, w_in, b_in, w_out, b_out)
    assert value.shape == (B, N, DIM) and attn.shape == (B, N, N)
    # Tolerances relaxed slightly for the approx-reciprocal softmax denominator.
    assert jnp.allclose(value, ref_value, atol=2e-3, rtol=2e-3), "value mismatch"
    assert jnp.allclose(attn, ref_attn, atol=1e-3, rtol=1e-3), "attn mismatch"

    print("KERNEL_OK")
</pallas_src>

<mosaic_0001>
module attributes {stable_mosaic.version = 11 : i64} {
  func.func @_mha_kernel(%arg0: i32, %arg1: memref<2x8x32xf32, #tpu.memory_space<vmem>>, %arg2: memref<32x32xf32, #tpu.memory_space<vmem>>, %arg3: memref<32x32xf32, #tpu.memory_space<vmem>>, %arg4: memref<32x32xf32, #tpu.memory_space<vmem>>, %arg5: memref<1x32xf32, #tpu.memory_space<vmem>>, %arg6: memref<1x32xf32, #tpu.memory_space<vmem>>, %arg7: memref<1x32xf32, #tpu.memory_space<vmem>>, %arg8: memref<32x32xf32, #tpu.memory_space<vmem>>, %arg9: memref<1x32xf32, #tpu.memory_space<vmem>>, %arg10: memref<2x8x32xf32, #tpu.memory_space<vmem>>, %arg11: memref<2x8x8xf32, #tpu.memory_space<vmem>>, %arg12: memref<16x32xf32, #tpu.memory_space<vmem>>) attributes {dimension_semantics = [#tpu.dimension_semantics<parallel>], iteration_bounds = array<i64: 1>, scalar_prefetch = 0 : i64, scratch_operands = 1 : i64, tpu.core_type = #tpu.core_type<tc>, window_params = [{transform_indices = @transform_0, window_bounds = array<i64: 2, 8, 32>}, {pipeline_mode = #tpu.pipeline_mode<synchronous>, transform_indices = @transform_1, window_bounds = array<i64: 32, 32>}, {pipeline_mode = #tpu.pipeline_mode<synchronous>, transform_indices = @transform_2, window_bounds = array<i64: 32, 32>}, {pipeline_mode = #tpu.pipeline_mode<synchronous>, transform_indices = @transform_3, window_bounds = array<i64: 32, 32>}, {pipeline_mode = #tpu.pipeline_mode<synchronous>, transform_indices = @transform_4, window_bounds = array<i64: 1, 32>}, {pipeline_mode = #tpu.pipeline_mode<synchronous>, transform_indices = @transform_5, window_bounds = array<i64: 1, 32>}, {pipeline_mode = #tpu.pipeline_mode<synchronous>, transform_indices = @transform_6, window_bounds = array<i64: 1, 32>}, {pipeline_mode = #tpu.pipeline_mode<synchronous>, transform_indices = @transform_7, window_bounds = array<i64: 32, 32>}, {pipeline_mode = #tpu.pipeline_mode<synchronous>, transform_indices = @transform_8, window_bounds = array<i64: 1, 32>}, {transform_indices = @transform_9, window_bounds = array<i64: 2, 8, 32>}, {transform_indices = @transform_10, window_bounds = array<i64: 2, 8, 8>}]} {
    %c0 = arith.constant 0 : index
    %c0_0 = arith.constant 0 : index
    %c0_1 = arith.constant 0 : index
    %0 = vector.load %arg1[%c0, %c0_0, %c0_1] : memref<2x8x32xf32, #tpu.memory_space<vmem>>, vector<2x8x32xf32>
    %1 = vector.shape_cast %0 : vector<2x8x32xf32> to vector<16x32xf32>
    %c0_2 = arith.constant 0 : index
    %c0_3 = arith.constant 0 : index
    %2 = vector.load %arg2[%c0_2, %c0_3] : memref<32x32xf32, #tpu.memory_space<vmem>>, vector<32x32xf32>
    %cst = arith.constant dense<0.000000e+00> : vector<16x32xf32>
    %3 = tpu.matmul %1, %2, %cst {dimension_numbers = #tpu.dot_dimension_numbers<[1], [0], [0], [1], [0, 0, 1, 1], [], []>} : vector<16x32xf32>, vector<32x32xf32>, vector<16x32xf32> -> vector<16x32xf32>
    %c0_4 = arith.constant 0 : index
    %c0_5 = arith.constant 0 : index
    %4 = vector.load %arg5[%c0_4, %c0_5] : memref<1x32xf32, #tpu.memory_space<vmem>>, vector<1x32xf32>
    %5 = vector.broadcast %4 : vector<1x32xf32> to vector<16x32xf32>
    %6 = arith.addf %3, %5 : vector<16x32xf32>
    %c0_6 = arith.constant 0 : index
    %c0_7 = arith.constant 0 : index
    %7 = vector.load %arg3[%c0_6, %c0_7] : memref<32x32xf32, #tpu.memory_space<vmem>>, vector<32x32xf32>
    %cst_8 = arith.constant dense<0.000000e+00> : vector<16x32xf32>
    %8 = tpu.matmul %1, %7, %cst_8 {dimension_numbers = #tpu.dot_dimension_numbers<[1], [0], [0], [1], [0, 0, 1, 1], [], []>} : vector<16x32xf32>, vector<32x32xf32>, vector<16x32xf32> -> vector<16x32xf32>
    %c0_9 = arith.constant 0 : index
    %c0_10 = arith.constant 0 : index
    %9 = vector.load %arg6[%c0_9, %c0_10] : memref<1x32xf32, #tpu.memory_space<vmem>>, vector<1x32xf32>
    %10 = vector.broadcast %9 : vector<1x32xf32> to vector<16x32xf32>
    %11 = arith.addf %8, %10 : vector<16x32xf32>
    %c0_11 = arith.constant 0 : index
    %c0_12 = arith.constant 0 : index
    %12 = vector.load %arg4[%c0_11, %c0_12] : memref<32x32xf32, #tpu.memory_space<vmem>>, vector<32x32xf32>
    %cst_13 = arith.constant dense<0.000000e+00> : vector<16x32xf32>
    %13 = tpu.matmul %1, %12, %cst_13 {dimension_numbers = #tpu.dot_dimension_numbers<[1], [0], [0], [1], [0, 0, 1, 1], [], []>} : vector<16x32xf32>, vector<32x32xf32>, vector<16x32xf32> -> vector<16x32xf32>
    %c0_14 = arith.constant 0 : index
    %c0_15 = arith.constant 0 : index
    %14 = vector.load %arg7[%c0_14, %c0_15] : memref<1x32xf32, #tpu.memory_space<vmem>>, vector<1x32xf32>
    %15 = vector.broadcast %14 : vector<1x32xf32> to vector<16x32xf32>
    %16 = arith.addf %13, %15 : vector<16x32xf32>
    %17 = vector.shape_cast %6 : vector<16x32xf32> to vector<2x8x32xf32>
    %18 = vector.shape_cast %11 : vector<16x32xf32> to vector<2x8x32xf32>
    %19 = vector.shape_cast %16 : vector<16x32xf32> to vector<2x8x32xf32>
    %cst_16 = arith.constant 0.000000e+00 : f32
    %20 = vector.broadcast %cst_16 : f32 to vector<2x8x8xf32>
    %21 = vector.extract_strided_slice %17 {offsets = [0, 0, 0], sizes = [2, 8, 4], strides = [1, 1, 1]} : vector<2x8x32xf32> to vector<2x8x4xf32>
    %22 = vector.extract_strided_slice %18 {offsets = [0, 0, 0], sizes = [2, 8, 4], strides = [1, 1, 1]} : vector<2x8x32xf32> to vector<2x8x4xf32>
    %23 = vector.extract_strided_slice %19 {offsets = [0, 0, 0], sizes = [2, 8, 4], strides = [1, 1, 1]} : vector<2x8x32xf32> to vector<2x8x4xf32>
    "tpu.trace_start"() <{level = 10 : i32, message = "bnd,bmd->bnm"}> : () -> ()
    %cst_17 = arith.constant dense<0.000000e+00> : vector<2x8x8xf32>
    %24 = tpu.matmul %21, %22, %cst_17 {dimension_numbers = #tpu.dot_dimension_numbers<[2], [2], [1], [1], [0, 0, 0, 1, 1, 1], [0], [0]>} : vector<2x8x4xf32>, vector<2x8x4xf32>, vector<2x8x8xf32> -> vector<2x8x8xf32>
    "tpu.trace_stop"() : () -> ()
    %cst_18 = arith.constant dense<0xFF800000> : vector<2x8xf32>
    %25 = vector.multi_reduction <maximumf>, %24, %cst_18 [2] : vector<2x8x8xf32> to vector<2x8xf32>
    %26 = vector.shape_cast %25 : vector<2x8xf32> to vector<2x8x1xf32>
    %27 = vector.broadcast %26 : vector<2x8x1xf32> to vector<2x8x8xf32>
    %28 = arith.subf %24, %27 : vector<2x8x8xf32>
    %29 = math.exp %28 : vector<2x8x8xf32>
    %cst_19 = arith.constant dense<0.000000e+00> : vector<2x8xf32>
    %30 = vector.multi_reduction <add>, %29, %cst_19 [2] : vector<2x8x8xf32> to vector<2x8xf32>
    %31 = vector.shape_cast %30 : vector<2x8xf32> to vector<2x8x1xf32>
    %32 = tpu.reciprocal %31 {approx = true} : vector<2x8x1xf32> -> vector<2x8x1xf32>
    %33 = vector.broadcast %32 : vector<2x8x1xf32> to vector<2x8x8xf32>
    %34 = arith.mulf %29, %33 : vector<2x8x8xf32>
    %35 = arith.addf %20, %34 : vector<2x8x8xf32>
    "tpu.trace_start"() <{level = 10 : i32, message = "bnm,bmd->bnd"}> : () -> ()
    %cst_20 = arith.constant dense<0.000000e+00> : vector<2x8x4xf32>
    %36 = tpu.matmul %34, %23, %cst_20 {dimension_numbers = #tpu.dot_dimension_numbers<[2], [1], [1], [2], [0, 0, 0, 1, 1, 2], [0], [0]>} : vector<2x8x8xf32>, vector<2x8x4xf32>, vector<2x8x4xf32> -> vector<2x8x4xf32>
    "tpu.trace_stop"() : () -> ()
    %37 = vector.shape_cast %36 : vector<2x8x4xf32> to vector<16x4xf32>
    %c0_21 = arith.constant 0 : index
    %c0_22 = arith.constant 0 : index
    %38 = vector.load %arg12[%c0_21, %c0_22] : memref<16x32xf32, #tpu.memory_space<vmem>>, vector<16x4xf32>
    tpu.vector_store %arg12[%c0_21, %c0_22], %37 {strides = array<i32>} : memref<16x32xf32, #tpu.memory_space<vmem>>, vector<16x4xf32>,
    %39 = vector.extract_strided_slice %17 {offsets = [0, 0, 4], sizes = [2, 8, 4], strides = [1, 1, 1]} : vector<2x8x32xf32> to vector<2x8x4xf32>
    %40 = vector.extract_strided_slice %18 {offsets = [0, 0, 4], sizes = [2, 8, 4], strides = [1, 1, 1]} : vector<2x8x32xf32> to vector<2x8x4xf32>
    %41 = vector.extract_strided_slice %19 {offsets = [0, 0, 4], sizes = [2, 8, 4], strides = [1, 1, 1]} : vector<2x8x32xf32> to vector<2x8x4xf32>
    "tpu.trace_start"() <{level = 10 : i32, message = "bnd,bmd->bnm"}> : () -> ()
    %cst_23 = arith.constant dense<0.000000e+00> : vector<2x8x8xf32>
    %42 = tpu.matmul %39, %40, %cst_23 {dimension_numbers = #tpu.dot_dimension_numbers<[2], [2], [1], [1], [0, 0, 0, 1, 1, 1], [0], [0]>} : vector<2x8x4xf32>, vector<2x8x4xf32>, vector<2x8x8xf32> -> vector<2x8x8xf32>
    "tpu.trace_stop"() : () -> ()
    %cst_24 = arith.constant dense<0xFF800000> : vector<2x8xf32>
    %43 = vector.multi_reduction <maximumf>, %42, %cst_24 [2] : vector<2x8x8xf32> to vector<2x8xf32>
    %44 = vector.shape_cast %43 : vector<2x8xf32> to vector<2x8x1xf32>
    %45 = vector.broadcast %44 : vector<2x8x1xf32> to vector<2x8x8xf32>
    %46 = arith.subf %42, %45 : vector<2x8x8xf32>
    %47 = math.exp %46 : vector<2x8x8xf32>
    %cst_25 = arith.constant dense<0.000000e+00> : vector<2x8xf32>
    %48 = vector.multi_reduction <add>, %47, %cst_25 [2] : vector<2x8x8xf32> to vector<2x8xf32>
    %49 = vector.shape_cast %48 : vector<2x8xf32> to vector<2x8x1xf32>
    %50 = tpu.reciprocal %49 {approx = true} : vector<2x8x1xf32> -> vector<2x8x1xf32>
    %51 = vector.broadcast %50 : vector<2x8x1xf32> to vector<2x8x8xf32>
    %52 = arith.mulf %47, %51 : vector<2x8x8xf32>
    %53 = arith.addf %35, %52 : vector<2x8x8xf32>
    "tpu.trace_start"() <{level = 10 : i32, message = "bnm,bmd->bnd"}> : () -> ()
    %cst_26 = arith.constant dense<0.000000e+00> : vector<2x8x4xf32>
    %54 = tpu.matmul %52, %41, %cst_26 {dimension_numbers = #tpu.dot_dimension_numbers<[2], [1], [1], [2], [0, 0, 0, 1, 1, 2], [0], [0]>} : vector<2x8x8xf32>, vector<2x8x4xf32>, vector<2x8x4xf32> -> vector<2x8x4xf32>
    "tpu.trace_stop"() : () -> ()
    %55 = vector.shape_cast %54 : vector<2x8x4xf32> to vector<16x4xf32>
    %c0_27 = arith.constant 0 : index
    %c4 = arith.constant 4 : index
    %56 = vector.load %arg12[%c0_27, %c4] : memref<16x32xf32, #tpu.memory_space<vmem>>, vector<16x4xf32>
    tpu.vector_store %arg12[%c0_27, %c4], %55 {strides = array<i32>} : memref<16x32xf32, #tpu.memory_space<vmem>>, vector<16x4xf32>,
    %57 = vector.extract_strided_slice %17 {offsets = [0, 0, 8], sizes = [2, 8, 4], strides = [1, 1, 1]} : vector<2x8x32xf32> to vector<2x8x4xf32>
    %58 = vector.extract_strided_slice %18 {offsets = [0, 0, 8], sizes = [2, 8, 4], strides = [1, 1, 1]} : vector<2x8x32xf32> to vector<2x8x4xf32>
    %59 = vector.extract_strided_slice %19 {offsets = [0, 0, 8], sizes = [2, 8, 4], strides = [1, 1, 1]} : vector<2x8x32xf32> to vector<2x8x4xf32>
    "tpu.trace_start"() <{level = 10 : i32, message = "bnd,bmd->bnm"}> : () -> ()
    %cst_28 = arith.constant dense<0.000000e+00> : vector<2x8x8xf32>
    %60 = tpu.matmul %57, %58, %cst_28 {dimension_numbers = #tpu.dot_dimension_numbers<[2], [2], [1], [1], [0, 0, 0, 1, 1, 1], [0], [0]>} : vector<2x8x4xf32>, vector<2x8x4xf32>, vector<2x8x8xf32> -> vector<2x8x8xf32>
    "tpu.trace_stop"() : () -> ()
    %cst_29 = arith.constant dense<0xFF800000> : vector<2x8xf32>
    %61 = vector.multi_reduction <maximumf>, %60, %cst_29 [2] : vector<2x8x8xf32> to vector<2x8xf32>
    %62 = vector.shape_cast %61 : vector<2x8xf32> to vector<2x8x1xf32>
    %63 = vector.broadcast %62 : vector<2x8x1xf32> to vector<2x8x8xf32>
    %64 = arith.subf %60, %63 : vector<2x8x8xf32>
    %65 = math.exp %64 : vector<2x8x8xf32>
    %cst_30 = arith.constant dense<0.000000e+00> : vector<2x8xf32>
    %66 = vector.multi_reduction <add>, %65, %cst_30 [2] : vector<2x8x8xf32> to vector<2x8xf32>
    %67 = vector.shape_cast %66 : vector<2x8xf32> to vector<2x8x1xf32>
    %68 = tpu.reciprocal %67 {approx = true} : vector<2x8x1xf32> -> vector<2x8x1xf32>
    %69 = vector.broadcast %68 : vector<2x8x1xf32> to vector<2x8x8xf32>
    %70 = arith.mulf %65, %69 : vector<2x8x8xf32>
    %71 = arith.addf %53, %70 : vector<2x8x8xf32>
    "tpu.trace_start"() <{level = 10 : i32, message = "bnm,bmd->bnd"}> : () -> ()
    %cst_31 = arith.constant dense<0.000000e+00> : vector<2x8x4xf32>
    %72 = tpu.matmul %70, %59, %cst_31 {dimension_numbers = #tpu.dot_dimension_numbers<[2], [1], [1], [2], [0, 0, 0, 1, 1, 2], [0], [0]>} : vector<2x8x8xf32>, vector<2x8x4xf32>, vector<2x8x4xf32> -> vector<2x8x4xf32>
    "tpu.trace_stop"() : () -> ()
    %73 = vector.shape_cast %72 : vector<2x8x4xf32> to vector<16x4xf32>
    %c0_32 = arith.constant 0 : index
    %c8 = arith.constant 8 : index
    %74 = vector.load %arg12[%c0_32, %c8] : memref<16x32xf32, #tpu.memory_space<vmem>>, vector<16x4xf32>
    tpu.vector_store %arg12[%c0_32, %c8], %73 {strides = array<i32>} : memref<16x32xf32, #tpu.memory_space<vmem>>, vector<16x4xf32>,
    %75 = vector.extract_strided_slice %17 {offsets = [0, 0, 12], sizes = [2, 8, 4], strides = [1, 1, 1]} : vector<2x8x32xf32> to vector<2x8x4xf32>
    %76 = vector.extract_strided_slice %18 {offsets = [0, 0, 12], sizes = [2, 8, 4], strides = [1, 1, 1]} : vector<2x8x32xf32> to vector<2x8x4xf32>
    %77 = vector.extract_strided_slice %19 {offsets = [0, 0, 12], sizes = [2, 8, 4], strides = [1, 1, 1]} : vector<2x8x32xf32> to vector<2x8x4xf32>
    "tpu.trace_start"() <{level = 10 : i32, message = "bnd,bmd->bnm"}> : () -> ()
    %cst_33 = arith.constant dense<0.000000e+00> : vector<2x8x8xf32>
    %78 = tpu.matmul %75, %76, %cst_33 {dimension_numbers = #tpu.dot_dimension_numbers<[2], [2], [1], [1], [0, 0, 0, 1, 1, 1], [0], [0]>} : vector<2x8x4xf32>, vector<2x8x4xf32>, vector<2x8x8xf32> -> vector<2x8x8xf32>
    "tpu.trace_stop"() : () -> ()
    %cst_34 = arith.constant dense<0xFF800000> : vector<2x8xf32>
    %79 = vector.multi_reduction <maximumf>, %78, %cst_34 [2] : vector<2x8x8xf32> to vector<2x8xf32>
    %80 = vector.shape_cast %79 : vector<2x8xf32> to vector<2x8x1xf32>
    %81 = vector.broadcast %80 : vector<2x8x1xf32> to vector<2x8x8xf32>
    %82 = arith.subf %78, %81 : vector<2x8x8xf32>
    %83 = math.exp %82 : vector<2x8x8xf32>
    %cst_35 = arith.constant dense<0.000000e+00> : vector<2x8xf32>
    %84 = vector.multi_reduction <add>, %83, %cst_35 [2] : vector<2x8x8xf32> to vector<2x8xf32>
    %85 = vector.shape_cast %84 : vector<2x8xf32> to vector<2x8x1xf32>
    %86 = tpu.reciprocal %85 {approx = true} : vector<2x8x1xf32> -> vector<2x8x1xf32>
    %87 = vector.broadcast %86 : vector<2x8x1xf32> to vector<2x8x8xf32>
    %88 = arith.mulf %83, %87 : vector<2x8x8xf32>
    %89 = arith.addf %71, %88 : vector<2x8x8xf32>
    "tpu.trace_start"() <{level = 10 : i32, message = "bnm,bmd->bnd"}> : () -> ()
    %cst_36 = arith.constant dense<0.000000e+00> : vector<2x8x4xf32>
    %90 = tpu.matmul %88, %77, %cst_36 {dimension_numbers = #tpu.dot_dimension_numbers<[2], [1], [1], [2], [0, 0, 0, 1, 1, 2], [0], [0]>} : vector<2x8x8xf32>, vector<2x8x4xf32>, vector<2x8x4xf32> -> vector<2x8x4xf32>
    "tpu.trace_stop"() : () -> ()
    %91 = vector.shape_cast %90 : vector<2x8x4xf32> to vector<16x4xf32>
    %c0_37 = arith.constant 0 : index
    %c12 = arith.constant 12 : index
    %92 = vector.load %arg12[%c0_37, %c12] : memref<16x32xf32, #tpu.memory_space<vmem>>, vector<16x4xf32>
    tpu.vector_store %arg12[%c0_37, %c12], %91 {strides = array<i32>} : memref<16x32xf32, #tpu.memory_space<vmem>>, vector<16x4xf32>,
    %93 = vector.extract_strided_slice %17 {offsets = [0, 0, 16], sizes = [2, 8, 4], strides = [1, 1, 1]} : vector<2x8x32xf32> to vector<2x8x4xf32>
    %94 = vector.extract_strided_slice %18 {offsets = [0, 0, 16], sizes = [2, 8, 4], strides = [1, 1, 1]} : vector<2x8x32xf32> to vector<2x8x4xf32>
    %95 = vector.extract_strided_slice %19 {offsets = [0, 0, 16], sizes = [2, 8, 4], strides = [1, 1, 1]} : vector<2x8x32xf32> to vector<2x8x4xf32>
    "tpu.trace_start"() <{level = 10 : i32, message = "bnd,bmd->bnm"}> : () -> ()
    %cst_38 = arith.constant dense<0.000000e+00> : vector<2x8x8xf32>
    %96 = tpu.matmul %93, %94, %cst_38 {dimension_numbers = #tpu.dot_dimension_numbers<[2], [2], [1], [1], [0, 0, 0, 1, 1, 1], [0], [0]>} : vector<2x8x4xf32>, vector<2x8x4xf32>, vector<2x8x8xf32> -> vector<2x8x8xf32>
    "tpu.trace_stop"() : () -> ()
    %cst_39 = arith.constant dense<0xFF800000> : vector<2x8xf32>
    %97 = vector.multi_reduction <maximumf>, %96, %cst_39 [2] : vector<2x8x8xf32> to vector<2x8xf32>
    %98 = vector.shape_cast %97 : vector<2x8xf32> to vector<2x8x1xf32>
    %99 = vector.broadcast %98 : vector<2x8x1xf32> to vector<2x8x8xf32>
    %100 = arith.subf %96, %99 : vector<2x8x8xf32>
    %101 = math.exp %100 : vector<2x8x8xf32>
    %cst_40 = arith.constant dense<0.000000e+00> : vector<2x8xf32>
    %102 = vector.multi_reduction <add>, %101, %cst_40 [2] : vector<2x8x8xf32> to vector<2x8xf32>
    %103 = vector.shape_cast %102 : vector<2x8xf32> to vector<2x8x1xf32>
    %104 = tpu.reciprocal %103 {approx = true} : vector<2x8x1xf32> -> vector<2x8x1xf32>
    %105 = vector.broadcast %104 : vector<2x8x1xf32> to vector<2x8x8xf32>
    %106 = arith.mulf %101, %105 : vector<2x8x8xf32>
    %107 = arith.addf %89, %106 : vector<2x8x8xf32>
    "tpu.trace_start"() <{level = 10 : i32, message = "bnm,bmd->bnd"}> : () -> ()
    %cst_41 = arith.constant dense<0.000000e+00> : vector<2x8x4xf32>
    %108 = tpu.matmul %106, %95, %cst_41 {dimension_numbers = #tpu.dot_dimension_numbers<[2], [1], [1], [2], [0, 0, 0, 1, 1, 2], [0], [0]>} : vector<2x8x8xf32>, vector<2x8x4xf32>, vector<2x8x4xf32> -> vector<2x8x4xf32>
    "tpu.trace_stop"() : () -> ()
    %109 = vector.shape_cast %108 : vector<2x8x4xf32> to vector<16x4xf32>
    %c0_42 = arith.constant 0 : index
    %c16 = arith.constant 16 : index
    %110 = vector.load %arg12[%c0_42, %c16] : memref<16x32xf32, #tpu.memory_space<vmem>>, vector<16x4xf32>
    tpu.vector_store %arg12[%c0_42, %c16], %109 {strides = array<i32>} : memref<16x32xf32, #tpu.memory_space<vmem>>, vector<16x4xf32>,
    %111 = vector.extract_strided_slice %17 {offsets = [0, 0, 20], sizes = [2, 8, 4], strides = [1, 1, 1]} : vector<2x8x32xf32> to vector<2x8x4xf32>
    %112 = vector.extract_strided_slice %18 {offsets = [0, 0, 20], sizes = [2, 8, 4], strides = [1, 1, 1]} : vector<2x8x32xf32> to vector<2x8x4xf32>
    %113 = vector.extract_strided_slice %19 {offsets = [0, 0, 20], sizes = [2, 8, 4], strides = [1, 1, 1]} : vector<2x8x32xf32> to vector<2x8x4xf32>
    "tpu.trace_start"() <{level = 10 : i32, message = "bnd,bmd->bnm"}> : () -> ()
    %cst_43 = arith.constant dense<0.000000e+00> : vector<2x8x8xf32>
    %114 = tpu.matmul %111, %112, %cst_43 {dimension_numbers = #tpu.dot_dimension_numbers<[2], [2], [1], [1], [0, 0, 0, 1, 1, 1], [0], [0]>} : vector<2x8x4xf32>, vector<2x8x4xf32>, vector<2x8x8xf32> -> vector<2x8x8xf32>
    "tpu.trace_stop"() : () -> ()
    %cst_44 = arith.constant dense<0xFF800000> : vector<2x8xf32>
    %115 = vector.multi_reduction <maximumf>, %114, %cst_44 [2] : vector<2x8x8xf32> to vector<2x8xf32>
    %116 = vector.shape_cast %115 : vector<2x8xf32> to vector<2x8x1xf32>
    %117 = vector.broadcast %116 : vector<2x8x1xf32> to vector<2x8x8xf32>
    %118 = arith.subf %114, %117 : vector<2x8x8xf32>
    %119 = math.exp %118 : vector<2x8x8xf32>
    %cst_45 = arith.constant dense<0.000000e+00> : vector<2x8xf32>
    %120 = vector.multi_reduction <add>, %119, %cst_45 [2] : vector<2x8x8xf32> to vector<2x8xf32>
    %121 = vector.shape_cast %120 : vector<2x8xf32> to vector<2x8x1xf32>
    %122 = tpu.reciprocal %121 {approx = true} : vector<2x8x1xf32> -> vector<2x8x1xf32>
    %123 = vector.broadcast %122 : vector<2x8x1xf32> to vector<2x8x8xf32>
    %124 = arith.mulf %119, %123 : vector<2x8x8xf32>
    %125 = arith.addf %107, %124 : vector<2x8x8xf32>
    "tpu.trace_start"() <{level = 10 : i32, message = "bnm,bmd->bnd"}> : () -> ()
    %cst_46 = arith.constant dense<0.000000e+00> : vector<2x8x4xf32>
    %126 = tpu.matmul %124, %113, %cst_46 {dimension_numbers = #tpu.dot_dimension_numbers<[2], [1], [1], [2], [0, 0, 0, 1, 1, 2], [0], [0]>} : vector<2x8x8xf32>, vector<2x8x4xf32>, vector<2x8x4xf32> -> vector<2x8x4xf32>
    "tpu.trace_stop"() : () -> ()
    %127 = vector.shape_cast %126 : vector<2x8x4xf32> to vector<16x4xf32>
    %c0_47 = arith.constant 0 : index
    %c20 = arith.constant 20 : index
    %128 = vector.load %arg12[%c0_47, %c20] : memref<16x32xf32, #tpu.memory_space<vmem>>, vector<16x4xf32>
    tpu.vector_store %arg12[%c0_47, %c20], %127 {strides = array<i32>} : memref<16x32xf32, #tpu.memory_space<vmem>>, vector<16x4xf32>,
    %129 = vector.extract_strided_slice %17 {offsets = [0, 0, 24], sizes = [2, 8, 4], strides = [1, 1, 1]} : vector<2x8x32xf32> to vector<2x8x4xf32>
    %130 = vector.extract_strided_slice %18 {offsets = [0, 0, 24], sizes = [2, 8, 4], strides = [1, 1, 1]} : vector<2x8x32xf32> to vector<2x8x4xf32>
    %131 = vector.extract_strided_slice %19 {offsets = [0, 0, 24], sizes = [2, 8, 4], strides = [1, 1, 1]} : vector<2x8x32xf32> to vector<2x8x4xf32>
    "tpu.trace_start"() <{level = 10 : i32, message = "bnd,bmd->bnm"}> : () -> ()
    %cst_48 = arith.constant dense<0.000000e+00> : vector<2x8x8xf32>
    %132 = tpu.matmul %129, %130, %cst_48 {dimension_numbers = #tpu.dot_dimension_numbers<[2], [2], [1], [1], [0, 0, 0, 1, 1, 1], [0], [0]>} : vector<2x8x4xf32>, vector<2x8x4xf32>, vector<2x8x8xf32> -> vector<2x8x8xf32>
    "tpu.trace_stop"() : () -> ()
    %cst_49 = arith.constant dense<0xFF800000> : vector<2x8xf32>
    %133 = vector.multi_reduction <maximumf>, %132, %cst_49 [2] : vector<2x8x8xf32> to vector<2x8xf32>
    %134 = vector.shape_cast %133 : vector<2x8xf32> to vector<2x8x1xf32>
    %135 = vector.broadcast %134 : vector<2x8x1xf32> to vector<2x8x8xf32>
    %136 = arith.subf %132, %135 : vector<2x8x8xf32>
    %137 = math.exp %136 : vector<2x8x8xf32>
    %cst_50 = arith.constant dense<0.000000e+00> : vector<2x8xf32>
    %138 = vector.multi_reduction <add>, %137, %cst_50 [2] : vector<2x8x8xf32> to vector<2x8xf32>
    %139 = vector.shape_cast %138 : vector<2x8xf32> to vector<2x8x1xf32>
    %140 = tpu.reciprocal %139 {approx = true} : vector<2x8x1xf32> -> vector<2x8x1xf32>
    %141 = vector.broadcast %140 : vector<2x8x1xf32> to vector<2x8x8xf32>
    %142 = arith.mulf %137, %141 : vector<2x8x8xf32>
    %143 = arith.addf %125, %142 : vector<2x8x8xf32>
    "tpu.trace_start"() <{level = 10 : i32, message = "bnm,bmd->bnd"}> : () -> ()
    %cst_51 = arith.constant dense<0.000000e+00> : vector<2x8x4xf32>
    %144 = tpu.matmul %142, %131, %cst_51 {dimension_numbers = #tpu.dot_dimension_numbers<[2], [1], [1], [2], [0, 0, 0, 1, 1, 2], [0], [0]>} : vector<2x8x8xf32>, vector<2x8x4xf32>, vector<2x8x4xf32> -> vector<2x8x4xf32>
    "tpu.trace_stop"() : () -> ()
    %145 = vector.shape_cast %144 : vector<2x8x4xf32> to vector<16x4xf32>
    %c0_52 = arith.constant 0 : index
    %c24 = arith.constant 24 : index
    %146 = vector.load %arg12[%c0_52, %c24] : memref<16x32xf32, #tpu.memory_space<vmem>>, vector<16x4xf32>
    tpu.vector_store %arg12[%c0_52, %c24], %145 {strides = array<i32>} : memref<16x32xf32, #tpu.memory_space<vmem>>, vector<16x4xf32>,
    %147 = vector.extract_strided_slice %17 {offsets = [0, 0, 28], sizes = [2, 8, 4], strides = [1, 1, 1]} : vector<2x8x32xf32> to vector<2x8x4xf32>
    %148 = vector.extract_strided_slice %18 {offsets = [0, 0, 28], sizes = [2, 8, 4], strides = [1, 1, 1]} : vector<2x8x32xf32> to vector<2x8x4xf32>
    %149 = vector.extract_strided_slice %19 {offsets = [0, 0, 28], sizes = [2, 8, 4], strides = [1, 1, 1]} : vector<2x8x32xf32> to vector<2x8x4xf32>
    "tpu.trace_start"() <{level = 10 : i32, message = "bnd,bmd->bnm"}> : () -> ()
    %cst_53 = arith.constant dense<0.000000e+00> : vector<2x8x8xf32>
    %150 = tpu.matmul %147, %148, %cst_53 {dimension_numbers = #tpu.dot_dimension_numbers<[2], [2], [1], [1], [0, 0, 0, 1, 1, 1], [0], [0]>} : vector<2x8x4xf32>, vector<2x8x4xf32>, vector<2x8x8xf32> -> vector<2x8x8xf32>
    "tpu.trace_stop"() : () -> ()
    %cst_54 = arith.constant dense<0xFF800000> : vector<2x8xf32>
    %151 = vector.multi_reduction <maximumf>, %150, %cst_54 [2] : vector<2x8x8xf32> to vector<2x8xf32>
    %152 = vector.shape_cast %151 : vector<2x8xf32> to vector<2x8x1xf32>
    %153 = vector.broadcast %152 : vector<2x8x1xf32> to vector<2x8x8xf32>
    %154 = arith.subf %150, %153 : vector<2x8x8xf32>
    %155 = math.exp %154 : vector<2x8x8xf32>
    %cst_55 = arith.constant dense<0.000000e+00> : vector<2x8xf32>
    %156 = vector.multi_reduction <add>, %155, %cst_55 [2] : vector<2x8x8xf32> to vector<2x8xf32>
    %157 = vector.shape_cast %156 : vector<2x8xf32> to vector<2x8x1xf32>
    %158 = tpu.reciprocal %157 {approx = true} : vector<2x8x1xf32> -> vector<2x8x1xf32>
    %159 = vector.broadcast %158 : vector<2x8x1xf32> to vector<2x8x8xf32>
    %160 = arith.mulf %155, %159 : vector<2x8x8xf32>
    %161 = arith.addf %143, %160 : vector<2x8x8xf32>
    "tpu.trace_start"() <{level = 10 : i32, message = "bnm,bmd->bnd"}> : () -> ()
    %cst_56 = arith.constant dense<0.000000e+00> : vector<2x8x4xf32>
    %162 = tpu.matmul %160, %149, %cst_56 {dimension_numbers = #tpu.dot_dimension_numbers<[2], [1], [1], [2], [0, 0, 0, 1, 1, 2], [0], [0]>} : vector<2x8x8xf32>, vector<2x8x4xf32>, vector<2x8x4xf32> -> vector<2x8x4xf32>
    "tpu.trace_stop"() : () -> ()
    %163 = vector.shape_cast %162 : vector<2x8x4xf32> to vector<16x4xf32>
    %c0_57 = arith.constant 0 : index
    %c28 = arith.constant 28 : index
    %164 = vector.load %arg12[%c0_57, %c28] : memref<16x32xf32, #tpu.memory_space<vmem>>, vector<16x4xf32>
    tpu.vector_store %arg12[%c0_57, %c28], %163 {strides = array<i32>} : memref<16x32xf32, #tpu.memory_space<vmem>>, vector<16x4xf32>,
    %c0_58 = arith.constant 0 : index
    %c0_59 = arith.constant 0 : index
    %165 = vector.load %arg12[%c0_58, %c0_59] : memref<16x32xf32, #tpu.memory_space<vmem>>, vector<16x32xf32>
    %c0_60 = arith.constant 0 : index
    %c0_61 = arith.constant 0 : index
    %166 = vector.load %arg8[%c0_60, %c0_61] : memref<32x32xf32, #tpu.memory_space<vmem>>, vector<32x32xf32>
    %cst_62 = arith.constant dense<0.000000e+00> : vector<16x32xf32>
    %167 = tpu.matmul %165, %166, %cst_62 {dimension_numbers = #tpu.dot_dimension_numbers<[1], [0], [0], [1], [0, 0, 1, 1], [], []>} : vector<16x32xf32>, vector<32x32xf32>, vector<16x32xf32> -> vector<16x32xf32>
    %c0_63 = arith.constant 0 : index
    %c0_64 = arith.constant 0 : index
    %168 = vector.load %arg9[%c0_63, %c0_64] : memref<1x32xf32, #tpu.memory_space<vmem>>, vector<1x32xf32>
    %169 = vector.broadcast %168 : vector<1x32xf32> to vector<16x32xf32>
    %170 = arith.addf %167, %169 : vector<16x32xf32>
    %171 = vector.shape_cast %170 : vector<16x32xf32> to vector<2x8x32xf32>
    %c0_65 = arith.constant 0 : index
    %c0_66 = arith.constant 0 : index
    %c0_67 = arith.constant 0 : index
    %172 = vector.load %arg10[%c0_65, %c0_66, %c0_67] : memref<2x8x32xf32, #tpu.memory_space<vmem>>, vector<2x8x32xf32>
    tpu.vector_store %arg10[%c0_65, %c0_66, %c0_67], %171 {strides = array<i32>} : memref<2x8x32xf32, #tpu.memory_space<vmem>>, vector<2x8x32xf32>,
    %cst_68 = arith.constant 1.250000e-01 : f32
    %173 = vector.broadcast %cst_68 : f32 to vector<2x8x8xf32>
    %174 = arith.mulf %161, %173 : vector<2x8x8xf32>
    %c0_69 = arith.constant 0 : index
    %c0_70 = arith.constant 0 : index
    %c0_71 = arith.constant 0 : index
    %175 = vector.load %arg11[%c0_69, %c0_70, %c0_71] : memref<2x8x8xf32, #tpu.memory_space<vmem>>, vector<2x8x8xf32>
    tpu.vector_store %arg11[%c0_69, %c0_70, %c0_71], %174 {strides = array<i32>} : memref<2x8x8xf32, #tpu.memory_space<vmem>>, vector<2x8x8xf32>,
    return
  }
  func.func @transform_0(%arg0: i32) -> (i32, i32, i32) {
    %c0_i32 = arith.constant 0 : i32
    %c0_i32_0 = arith.constant 0 : i32
    %c0_i32_1 = arith.constant 0 : i32
    return %arg0, %c0_i32, %c0_i32_0 : i32, i32, i32
  }
  func.func @transform_1(%arg0: i32) -> (i32, i32) {
    %c0_i32 = arith.constant 0 : i32
    %c0_i32_0 = arith.constant 0 : i32
    %c0_i32_1 = arith.constant 0 : i32
    return %c0_i32, %c0_i32_0 : i32, i32
  }
  func.func @transform_2(%arg0: i32) -> (i32, i32) {
    %c0_i32 = arith.constant 0 : i32
    %c0_i32_0 = arith.constant 0 : i32
    %c0_i32_1 = arith.constant 0 : i32
    return %c0_i32, %c0_i32_0 : i32, i32
  }
  func.func @transform_3(%arg0: i32) -> (i32, i32) {
    %c0_i32 = arith.constant 0 : i32
    %c0_i32_0 = arith.constant 0 : i32
    %c0_i32_1 = arith.constant 0 : i32
    return %c0_i32, %c0_i32_0 : i32, i32
  }
  func.func @transform_4(%arg0: i32) -> (i32, i32) {
    %c0_i32 = arith.constant 0 : i32
    %c0_i32_0 = arith.constant 0 : i32
    %c0_i32_1 = arith.constant 0 : i32
    return %c0_i32, %c0_i32_0 : i32, i32
  }
  func.func @transform_5(%arg0: i32) -> (i32, i32) {
    %c0_i32 = arith.constant 0 : i32
    %c0_i32_0 = arith.constant 0 : i32
    %c0_i32_1 = arith.constant 0 : i32
    return %c0_i32, %c0_i32_0 : i32, i32
  }
  func.func @transform_6(%arg0: i32) -> (i32, i32) {
    %c0_i32 = arith.constant 0 : i32
    %c0_i32_0 = arith.constant 0 : i32
    %c0_i32_1 = arith.constant 0 : i32
    return %c0_i32, %c0_i32_0 : i32, i32
  }
  func.func @transform_7(%arg0: i32) -> (i32, i32) {
    %c0_i32 = arith.constant 0 : i32
    %c0_i32_0 = arith.constant 0 : i32
    %c0_i32_1 = arith.constant 0 : i32
    return %c0_i32, %c0_i32_0 : i32, i32
  }
  func.func @transform_8(%arg0: i32) -> (i32, i32) {
    %c0_i32 = arith.constant 0 : i32
    %c0_i32_0 = arith.constant 0 : i32
    %c0_i32_1 = arith.constant 0 : i32
    return %c0_i32, %c0_i32_0 : i32, i32
  }
  func.func @transform_9(%arg0: i32) -> (i32, i32, i32) {
    %c0_i32 = arith.constant 0 : i32
    %c0_i32_0 = arith.constant 0 : i32
    %c0_i32_1 = arith.constant 0 : i32
    return %arg0, %c0_i32, %c0_i32_0 : i32, i32, i32
  }
  func.func @transform_10(%arg0: i32) -> (i32, i32, i32) {
    %c0_i32 = arith.constant 0 : i32
    %c0_i32_0 = arith.constant 0 : i32
    %c0_i32_1 = arith.constant 0 : i32
    return %arg0, %c0_i32, %c0_i32_0 : i32, i32, i32
  }
}

</mosaic_0001>

<bundles_post_ra>
// kernel: tpu_custom_call.1
= control target key start
LH: loop header
LB: loop body
LE: loop exit
PB: predicated region body
PF: predicated region fallthrough
CT: control target
= control target key end

     0   :  { %16 = vsyncpa [#allocation4], 0  ;;  %s2186_s0 = inlined_call_operand.hbm [shape: f32[2,8,32], index: 0, kind: input, shape index: {}]   ;;  %s2187_s1 = inlined_call_operand.hbm [shape: f32[32,32], index: 1, kind: input, shape index: {}]   ;;  %s2188_s2 = inlined_call_operand.hbm [shape: f32[32,32], index: 2, kind: input, shape index: {}]   ;;  %s2189_s3 = inlined_call_operand.hbm [shape: f32[32,32], index: 3, kind: input, shape index: {}]   ;;  %s2190_s4 = inlined_call_operand.vmem [shape: f32[1,32], index: 4, kind: input, shape index: {}]   ;;  %s2191_s5 = inlined_call_operand.vmem [shape: f32[1,32], index: 5, kind: input, shape index: {}]   ;;  %s2192_s6 = inlined_call_operand.vmem [shape: f32[1,32], index: 6, kind: input, shape index: {}]   ;;  %s2193_s7 = inlined_call_operand.hbm [shape: f32[32,32], index: 7, kind: input, shape index: {}]   ;;  %s2194_s8 = inlined_call_operand.vmem [shape: f32[1,32], index: 8, kind: input, shape index: {}]   ;;  %s2195_s9 = inlined_call_operand.hbm [shape: f32[2,8,32], index: 9, kind: output, shape index: {0}]   ;;  %s2196_s10 = inlined_call_operand.hbm [shape: f32[2,8,8], index: 10, kind: output, shape index: {1}]  }
   0x1   :  { %17 = vsyncpa [#allocation7], 0 }
   0x2   :  { %18 = vsyncpa [#allocation10], 0 }
   0x3   :  { %19 = vsyncpa [#allocation5], 0 }
   0x4   :  { %20 = vsyncpa [#allocation14], 0  ;;  %s38_s15 = sshll.u32 %s2187_s1, 4  ;;  %s1782_s16 = smov [#allocation6]   ;;  %s39_s15 = int_to_ptr.hbm [resolvable:$true] %s38_s15 }
   0x5   :  { %s40_s17 = sshll.u32 %s1782_s16, 4  ;;  %s64_s20 = sshll.u32 %s2189_s3, 4  ;;  %s41_s17 = int_to_ptr.vmem [resolvable:$true] %s40_s17  ;;  %s65_s20 = int_to_ptr.hbm [resolvable:$true] %s64_s20 }
   0x6   :  { %s1783_s21 = smov 128   ;;  %s1784_s22 = smov 8  }
   0x7   :  { %46 = dma.hbm_to_vmem [thread:$0]  %s39_s15, 512, %s41_s17, [#allocation7], %s1783_s21, %s1783_s21, %s1784_s22  }
   0x8   :  { %s1785_s23 = smov [#allocation9]   ;;  %s25_s1 = sshll.u32 %s2186_s0, 4  ;;  %s26_s1 = int_to_ptr.hbm [resolvable:$true] %s25_s1 }
   0x9   :  { %s66_s24 = sshll.u32 %s1785_s23, 4  ;;  %s51_s28 = sshll.u32 %s2188_s2, 4  ;;  %s67_s24 = int_to_ptr.vmem [resolvable:$true] %s66_s24  ;;  %s52_s28 = int_to_ptr.hbm [resolvable:$true] %s51_s28 }
   0xa   :  { %72 = dma.hbm_to_vmem [thread:$0]  %s65_s20, 512, %s67_s24, [#allocation10], %s1783_s21, %s1783_s21, %s1784_s22  }
   0xb   :  { %s1786_s29 = smov [#allocation3]   ;;  %s1787_s11 = smov [#allocation8]  }
   0xc   :  { %s27_s30 = sshll.u32 %s1786_s29, 4  ;;  %s53_s0 = sshll.u32 %s1787_s11, 4  ;;  %s28_s30 = int_to_ptr.vmem [resolvable:$true] %s27_s30  ;;  %s54_s0 = int_to_ptr.vmem [resolvable:$true] %s53_s0 }
   0xd   :  { %33 = dma.hbm_to_vmem [thread:$0]  %s26_s1, 256, %s28_s30, [#allocation4], %s1783_s21, %s1783_s21, %s1784_s22  }
   0xe   :  { %s83_s14 = sshll.u32 %s2193_s7, 4  ;;  %s1788_s2 = smov [#allocation11]   ;;  %s84_s14 = int_to_ptr.hbm [resolvable:$true] %s83_s14 }
   0xf   :  { %59 = dma.hbm_to_vmem [thread:$0]  %s52_s28, 512, %s54_s0, [#allocation7], %s1783_s21, %s1783_s21, %s1784_s22  }
  0x10   :  { %s85_s15 = sshll.u32 %s1788_s2, 4  ;;  %s86_s15 = int_to_ptr.vmem [resolvable:$true] %s85_s15 }
  0x11   :  { %91 = dma.hbm_to_vmem [thread:$0]  %s84_s14, 512, %s86_s15, [#allocation10], %s1783_s21, %s1783_s21, %s1784_s22  }
  0x12   :  { %1772 = dma.done.wait [#allocation4], 256  }
  0x13   :  { %1773 = vsyncadd [#allocation4], 4294967040 }
  0x14   :  { %1774 = dma.done.wait [#allocation7], 1024  }
  0x15   :  { %1775 = vsyncadd [#allocation7], 4294966272 }
  0x16   :  { %1776 = dma.done.wait [#allocation10], 1024  }
  0x17   :  { %1777 = vsyncadd [#allocation10], 4294966272  ;;  %v119_v0 = vld [vmem:[#allocation6 + $0x18] sm:$0xff]  ;;  %v118_v2 = vld [vmem:[#allocation6 + $0x10] sm:$0xff]  ;;  %vm124_vm0 = vcmask 261120   ;;  %vm216_vm1 = vcmask 31744  }
  0x18   :  { %v157_v1 = vld [vmem:[#allocation8 + $0x18] sm:$0xff]  ;;  %143 = vmatpush.msra.mxu0 %v119_v0  ;;  %v156_v3 = vld [vmem:[#allocation8 + $0x10] sm:$0xff]  ;;  %v117_v4 = vld [vmem:[#allocation6 + $0x8] sm:$0xff]  ;;  %s1789_s19 = smov 120   ;;  %s1790_s20 = smov 124   ;;  %vm269_vm2 = vcmask 64512  }
  0x19   :  { %174 = vmatpush.msra.mxu1 %v157_v1  ;;  %1485 = vmatpush.msra.mxu2 %v157_v1  ;;  %v155_v5 = vld [vmem:[#allocation8 + $0x8] sm:$0xff]  ;;  %v116_v6 = vld [vmem:[#allocation6] sm:$0xff]  ;;  %v114_v8 = vld [vmem:[#allocation3] sm:$0xff]  ;;  %s1793_s23 = smov 108   ;;  %s1794_s26 = smov 104   ;;  %vm484_vm3 = vcmask 64544  }
  0x1a   :  { %144 = vmatpush.msra.mxu0 %v118_v2  ;;  %v154_v7 = vld [vmem:[#allocation8] sm:$0xff]  ;;  %v115_v9 = vld [vmem:[#allocation3 + $0x8] sm:$0xff]  ;;  %v187_v11 = vld [vmem:[#allocation9 + $0x10] sm:$0xff]  ;;  %s1796_s1 = smov 4   ;;  %s1797_s3 = smov 12   ;;  %vm627_vm4 = vcmask 97344  }
  0x1b   :  { %175 = vmatpush.msra.mxu1 %v156_v3  ;;  %1486 = vmatpush.msra.mxu2 %v156_v3  ;;  %v188_v10 = vld [vmem:[#allocation9 + $0x18] sm:$0xff]  ;;  %v186_v12 = vld [vmem:[#allocation9 + $0x8] sm:$0xff]  ;;  %v185_v13 = vld [vmem:[#allocation9] sm:$0xff]  ;;  %s1798_s27 = smov 16   ;;  %s1799_s28 = smov 20   ;;  %vm770_vm5 = vcmask 130144  }
  0x1c   :  { %145 = vmatpush.msra.mxu0 %v117_v4  ;;  %v1536_v14 = vld [vmem:[%s2190_s4] ss:$0 sm:$0xff]  ;;  %s1791_s4 = smov 116   ;;  %s1800_s29 = smov 24   ;;  %vm913_vm6 = vcmask 162944   ;;  %vm1056_vm7 = vcmask 195744  }
  0x1d   :  { %176 = vmatpush.msra.mxu1 %v155_v5  ;;  %1487 = vmatpush.msra.mxu2 %v155_v5  ;;  %v1537_v15 = vld [vmem:[%s2191_s5] ss:$0 sm:$0xff]  ;;  %s1792_s5 = smov 112   ;;  %s1801_s30 = smov 28   ;;  %vm1199_vm8 = vcmask 228544   ;;  %vm1342_vm9 = vcmask 261344  }
  0x1e   :  { %146 = vmatpush.msra.mxu0 %v116_v6  ;;  %v1538_v25 = vld [vmem:[%s2192_s6] ss:$0 sm:$0xff]  ;;  %s1795_s6 = smov 100   ;;  %s1802_s11 = smov [#allocation13]  }
  0x1f   :  { %177 = vmatpush.msra.mxu1 %v154_v7  ;;  %1429 = vmatmul.msk.f32.vlgmr.msra.gmra.mxu0 %vm124_vm0, %v114_v8  ;;  %s1407_s0 = sshll.u32 %s1802_s11, 4  ;;  %s1409_s14 = sshll.u32 %s2196_s10, 4  ;;  %s1408_s0 = int_to_ptr.vmem [resolvable:$true] %s1407_s0  ;;  %s1410_s14 = int_to_ptr.hbm [resolvable:$true] %s1409_s14 }
  0x20   :  { %1431 = vmatmul.msk.f32.vlgmr.msra.gmra.mxu1 %vm124_vm0, %v114_v8  ;;  %1488 = vmatpush.msra.mxu2 %v154_v7  ;;  %s1803_s7 = smov [#allocation12]   ;;  %s1396_s10 = sshll.u32 %s2195_s9, 4  ;;  %s1397_s10 = int_to_ptr.hbm [resolvable:$true] %s1396_s10 }
  0x21   :  { %1432 = vmatmul.msk.f32.vlgmr.msra.gmra.mxu2 %vm124_vm0, %v115_v9  ;;  %s1394_s16 = sshll.u32 %s1803_s7, 4  ;;  %s1395_s16 = int_to_ptr.vmem [resolvable:$true] %s1394_s16 }
  0x22   :  { %205 = vmatpush.msrb.mxu2 %v188_v10 }
  0x24   :  { %206 = vmatpush.msrb.mxu2 %v187_v11 }
  0x26   :  { %207 = vmatpush.msrb.mxu2 %v186_v12 }
  0x27   :  { %1430 = vmatmul.msk.f32.gmra.mxu0 %vm124_vm0, %v115_v9 }
  0x28   :  { %208 = vmatpush.msrb.mxu2 %v185_v13 }
  0x29   :  { %1433 = vmatmul.msk.f32.vlgmr.msrb.gmra.mxu2 %vm124_vm0, %v114_v8 }
  0x31   :  { %1434 = vmatmul.msk.f32.gmra.mxu2 %vm124_vm0, %v115_v9 }
  0x9c   :  { %v148_v16 = vpop.f32.mrf.mxu0 }
  0x9d   :  { %v179_v17 = vpop.f32.mrf.mxu1  ;;  %v149_v18 = vadd.f32 %v1536_v14, %v148_v16 }
  0x9e   :  { %v180_v19 = vadd.f32 %v1537_v15, %v179_v17 }
  0x9f   :  { %487 = vrot.lane.b32.xlu2 %v149_v18, %s1789_s19 }
  0xa0   :  { %489 = vrot.lane.b32.xlu1 %v180_v19, %s1789_s19  ;;  %344 = vrot.lane.b32.xlu0 %v180_v19, %s1790_s20 }
  0xa1   :  { %1435 = vmatpush.xpose.msk.msra.mxu3 %vm216_vm1, %v180_v19 }
  0xa4   :  { %1436 = vmatmul.msk.f32.vlgmr.msra.gmra.mxu3 %vm216_vm1, %v149_v18  ;;  %v182_v20 = vpop.f32.mrf.mxu2  ;;  %v151_v21 = vpop.f32.mrf.mxu0 }
  0xa5   :  { %v183_v22 = vadd.f32 %v1537_v15, %v182_v20  ;;  %v152_v23 = vadd.f32 %v1536_v14, %v151_v21 }
  0xa7   :  { %1437 = vmatpush.xpose.msk.msrb.mxu3 %vm216_vm1, %v183_v22  ;;  %775 = vrot.lane.b32.xlu2 %v180_v19, %s1792_s5 }
  0xa8   :  { %632 = vrot.lane.b32.xlu1 %v180_v19, %s1791_s4  ;;  %342 = vrot.lane.b32.xlu0 %v149_v18, %s1790_s20 }
  0xac   :  { %1438 = vmatmul.msk.f32.vlgmr.msrb.gmra.mxu3 %vm216_vm1, %v152_v23  ;;  %v210_v24 = vpop.f32.mrf.mxu2 }
  0xad   :  { %v1923_v27 = vadd.f32 %v1538_v25, %v210_v24 }
  0xaf   :  { %370 = vrot.lane.b32.xlu2 %v152_v23, %s1790_s20  ;;  %312 = vmatpush.msra.mxu3 %v1923_v27 }
  0xb0   :  { %372 = vrot.lane.b32.xlu1 %v183_v22, %s1790_s20  ;;  %630 = vrot.lane.b32.xlu0 %v149_v18, %s1791_s4 }
  0xb4   :  { %v213_v26 = vpop.f32.mrf.mxu2 }
  0xb5   :  { %v1926_v28 = vadd.f32 %v1538_v25, %v213_v26 }
  0xb7   :  { %515 = vrot.lane.b32.xlu2 %v152_v23, %s1789_s19  ;;  %335 = vmatpush.msrb.mxu0 %v1926_v28  ;;  %v1511_v29 = vpack.i.bf16 %v1926_v28, %v1923_v27 }
  0xb8   :  { %773 = vrot.lane.b32.xlu1 %v149_v18, %s1792_s5  ;;  %517 = vrot.lane.b32.xlu0 %v183_v22, %s1789_s19 }
  0xbf   :  { %803 = vrot.lane.b32.xlu2 %v183_v22, %s1792_s5 }
  0xc0   :  { %660 = vrot.lane.b32.xlu1 %v183_v22, %s1791_s4  ;;  %918 = vrot.lane.b32.xlu0 %v180_v19, %s1793_s23 }
  0xc7   :  { %916 = vrot.lane.b32.xlu2 %v149_v18, %s1793_s23 }
  0xc8   :  { %1061 = vrot.lane.b32.xlu1 %v180_v19, %s1794_s26  ;;  %658 = vrot.lane.b32.xlu0 %v152_v23, %s1791_s4 }
  0xcf   :  { %944 = vrot.lane.b32.xlu2 %v152_v23, %s1793_s23 }
  0xd0   :  { %801 = vrot.lane.b32.xlu1 %v152_v23, %s1792_s5  ;;  %946 = vrot.lane.b32.xlu0 %v183_v22, %s1793_s23 }
  0xd7   :  { %1204 = vrot.lane.b32.xlu2 %v180_v19, %s1795_s6 }
  0xd8   :  { %1089 = vrot.lane.b32.xlu1 %v183_v22, %s1794_s26  ;;  %1059 = vrot.lane.b32.xlu0 %v149_v18, %s1794_s26 }
  0xdf   :  { %1232 = vrot.lane.b32.xlu2 %v183_v22, %s1795_s6 }
  0xe0   :  { %1202 = vrot.lane.b32.xlu1 %v149_v18, %s1795_s6  ;;  %1087 = vrot.lane.b32.xlu0 %v152_v23, %s1794_s26 }
  0xe7   :  { %1522 = vrot.lane.b32.xlu2 %v1511_v29, %s1791_s4 }
  0xe8   :  { %1512 = vrot.lane.b32.xlu1 %v1511_v29, %s1790_s20  ;;  %1230 = vrot.lane.b32.xlu0 %v152_v23, %s1795_s6 }
  0xf0   :  { %1527 = vrot.lane.b32.xlu1 %v1511_v29, %s1792_s5  ;;  %1517 = vrot.lane.b32.xlu0 %v1511_v29, %s1789_s19 }
  0xf9   :  { %v488_v30 = vpop.permute.xlu2 %487 }
 0x101   :  { %v776_v31 = vpop.permute.xlu2 %775 }
 0x109   :  { %v371_v32 = vpop.permute.xlu2 %370 }
 0x111   :  { %v516_v35 = vpop.permute.xlu2 %515 }
 0x112   :  { %v490_v33 = vpop.permute.xlu1 %489  ;;  %v345_v34 = vpop.permute.xlu0 %344 }
 0x113   :  { %1441 = vmatpush.xpose.msk.msrb.mxu1 %vm216_vm1, %v345_v34 }
 0x117   :  { %1447 = vmatpush.xpose.msk.msra.mxu1 %vm216_vm1, %v490_v33 }
 0x119   :  { %v804_v38 = vpop.permute.xlu2 %803 }
 0x11a   :  { %v633_v36 = vpop.permute.xlu1 %632  ;;  %v343_v37 = vpop.permute.xlu0 %342 }
 0x11b   :  { %1442 = vmatmul.msk.f32.vlgmr.msrb.gmra.mxu1 %vm216_vm1, %v343_v37 }
 0x11c   :  { %1453 = vmatpush.xpose.msk.msrb.mxu1 %vm216_vm1, %v633_v36 }
 0x121   :  { %v917_v42 = vpop.permute.xlu2 %916 }
 0x122   :  { %v373_v39 = vpop.permute.xlu1 %372  ;;  %v631_v40 = vpop.permute.xlu0 %630 }
 0x123   :  { %1443 = vmatpush.xpose.msk.msra.mxu2 %vm216_vm1, %v373_v39  ;;  %1448 = vmatmul.msk.f32.vlgmr.msra.gmra.mxu1 %vm216_vm1, %v488_v30 }
 0x124   :  { %1459 = vmatpush.xpose.msk.msra.mxu1 %vm216_vm1, %v776_v31 }
 0x126   :  { %1444 = vmatmul.msk.f32.vlgmr.msra.gmra.mxu2 %vm216_vm1, %v371_v32 }
 0x127   :  { %v240_v41 = vpop.f32.mrf.mxu3 }
 0x128   :  { %v270_v43 = vsel %vm269_vm2, %v240_v41, -inf }
 0x129   :  { %271 = vmax.xlane.f32.xlu1 %v270_v43  ;;  %v945_v48 = vpop.permute.xlu2 %944 }
 0x12a   :  { %v774_v44 = vpop.permute.xlu1 %773  ;;  %v518_v45 = vpop.permute.xlu0 %517 }
 0x12b   :  { %1449 = vmatpush.xpose.msk.msrb.mxu2 %vm216_vm1, %v518_v45  ;;  %1454 = vmatmul.msk.f32.vlgmr.msrb.gmra.mxu1 %vm216_vm1, %v631_v40 }
 0x12e   :  { %1450 = vmatmul.msk.f32.vlgmr.msrb.gmra.mxu2 %vm216_vm1, %v516_v35 }
 0x12f   :  { %v266_v46 = vpop.f32.mrf.mxu3 }
 0x130   :  { %v273_v47 = vsel %vm269_vm2, %v266_v46, -inf }
 0x131   :  { %274 = vmax.xlane.f32.xlu0 %v273_v47  ;;  %v1205_v53 = vpop.permute.xlu2 %1204 }
 0x132   :  { %v661_v49 = vpop.permute.xlu1 %660  ;;  %v919_v50 = vpop.permute.xlu0 %918 }
 0x133   :  { %1455 = vmatpush.xpose.msk.msra.mxu2 %vm216_vm1, %v661_v49  ;;  %1460 = vmatmul.msk.f32.vlgmr.msra.gmra.mxu1 %vm216_vm1, %v774_v44 }
 0x134   :  { %1465 = vmatpush.xpose.msk.msrb.mxu1 %vm216_vm1, %v919_v50 }
 0x137   :  { %1461 = vmatpush.xpose.msk.msrb.mxu2 %vm216_vm1, %v804_v38 }
 0x139   :  { %v1233_v58 = vpop.permute.xlu2 %1232 }
 0x13a   :  { %v1062_v51 = vpop.permute.xlu1 %1061  ;;  %v659_v52 = vpop.permute.xlu0 %658 }
 0x13b   :  { %1471 = vmatpush.xpose.msk.msra.mxu1 %vm216_vm1, %v1062_v51  ;;  %1456 = vmatmul.msk.f32.vlgmr.msra.gmra.mxu2 %vm216_vm1, %v659_v52 }
 0x13c   :  { %1466 = vmatmul.msk.f32.vlgmr.msrb.gmra.mxu1 %vm216_vm1, %v917_v42 }
 0x13f   :  { %1477 = vmatpush.xpose.msk.msrb.mxu1 %vm216_vm1, %v1205_v53 }
 0x141   :  { %v2035_v43 = vpop.permute.xlu2 %1522 }
 0x142   :  { %1532 = vrot.lane.b32.xlu1 %v1511_v29, %s1793_s23  ;;  %v802_v54 = vpop.permute.xlu1 %801  ;;  %v947_v55 = vpop.permute.xlu0 %946 }
 0x143   :  { %1462 = vmatmul.msk.f32.vlgmr.msrb.gmra.mxu2 %vm216_vm1, %v802_v54 }
 0x144   :  { %1467 = vmatpush.xpose.msk.msra.mxu2 %vm216_vm1, %v947_v55 }
 0x14a   :  { %v1090_v56 = vpop.permute.xlu1 %1089  ;;  %v1060_v57 = vpop.permute.xlu0 %1059 }
 0x14b   :  { %1473 = vmatpush.xpose.msk.msrb.mxu2 %vm216_vm1, %v1090_v56  ;;  %1472 = vmatmul.msk.f32.vlgmr.msra.gmra.mxu1 %vm216_vm1, %v1060_v57 }
 0x14c   :  { %1468 = vmatmul.msk.f32.vlgmr.msra.gmra.mxu2 %vm216_vm1, %v945_v48 }
 0x14f   :  { %1479 = vmatpush.xpose.msk.msra.mxu2 %vm216_vm1, %v1233_v58 }
 0x152   :  { %v1203_v59 = vpop.permute.xlu1 %1202  ;;  %v1088_v60 = vpop.permute.xlu0 %1087 }
 0x153   :  { %1478 = vmatmul.msk.f32.vlgmr.msrb.gmra.mxu1 %vm216_vm1, %v1203_v59 }
 0x154   :  { %1474 = vmatmul.msk.f32.vlgmr.msrb.gmra.mxu2 %vm216_vm1, %v1088_v60 }
 0x15a   :  { %v1513_v61 = vpop.permute.xlu1 %1512  ;;  %v1231_v62 = vpop.permute.xlu0 %1230 }
 0x15b   :  { %v1515_v63 = vunpack.i.h.bf16 %v1513_v61  ;;  %v1514_v0 = vunpack.i.l.bf16 %v1513_v61 }
 0x15c   :  { %1480 = vmatmul.msk.f32.vlgmr.msra.gmra.mxu2 %vm216_vm1, %v1231_v62 }
 0x15d   :  { %444 = vmatpush.msrb.mxu3 %v1514_v0  ;;  %471 = vmatpush.msra.mxu0 %v1515_v63 }
 0x162   :  { %v1979_v1 = vpop.permute.xlu1 %1527  ;;  %v1982_v4 = vpop.permute.xlu0 %1517 }
 0x163   :  { %v1519_v0 = vunpack.i.l.bf16 %v1982_v4 }
 0x198   :  { %v367_v2 = vpop.f32.mrf.mxu1 }
 0x199   :  { %v398_v3 = vsel %vm269_vm2, %v367_v2, -inf }
 0x19a   :  { %399 = vmax.xlane.f32.xlu2 %v398_v3 }
 0x19c   :  { %v272_v5 = vpop.xlane.xlu1 %271 }
 0x19d   :  { %v276_v6 = vsub.f32 %v240_v41, %v272_v5 }
 0x19f   :  { %v278_v7 = vmul.f32 1.442695, %v276_v6 }
 0x1a0   :  { %v512_v8 = vpop.f32.mrf.mxu1 }
 0x1a1   :  { %1540 = vpow2.f32 %v278_v7  ;;  %v543_v9 = vsel %vm269_vm2, %v512_v8, -inf }
 0x1a2   :  { %544 = vmax.xlane.f32.xlu2 %v543_v9 }
 0x1a4   :  { %v275_v10 = vpop.xlane.xlu0 %274 }
 0x1a5   :  { %v277_v11 = vsub.f32 %v266_v46, %v275_v10 }
 0x1a7   :  { %v1985_v12 = vpop.eup %1540  ;;  %v280_v13 = vmul.f32 1.442695, %v277_v11 }
 0x1a8   :  { %v282_v14 = vsel %vm269_vm2, %v1985_v12, 0.0  ;;  %v655_v15 = vpop.f32.mrf.mxu1 }
 0x1a9   :  { %1542 = vpow2.f32 %v280_v13  ;;  %283 = vadd.xlane.f32.xlu0 %v282_v14  ;;  %v395_v16 = vpop.f32.mrf.mxu2  ;;  %v686_v17 = vsel %vm269_vm2, %v655_v15, -inf }
 0x1aa   :  { %v401_v18 = vsel %vm269_vm2, %v395_v16, -inf  ;;  %687 = vmax.xlane.f32.xlu2 %v686_v17 }
 0x1ab   :  { %402 = vmax.xlane.f32.xlu1 %v401_v18 }
 0x1af   :  { %v1991_v19 = vpop.eup %1542 }
 0x1b0   :  { %v1993_v20 = vpop.f32.mrf.mxu1  ;;  %v285_v22 = vsel %vm269_vm2, %v1991_v19, 0.0 }
 0x1b1   :  { %v1995_v21 = vpop.f32.mrf.mxu2  ;;  %v829_v23 = vsel %vm269_vm2, %v1993_v20, -inf }
 0x1b2   :  { %286 = vadd.xlane.f32.xlu2 %v285_v22  ;;  %v546_v24 = vsel %vm269_vm2, %v1995_v21, -inf }
 0x1b3   :  { %830 = vmax.xlane.f32.xlu1 %v829_v23  ;;  %547 = vmax.xlane.f32.xlu0 %v546_v24 }
 0x1b4   :  { %v2037_v47 = vpop.permute.xlu1 %1532 }
 0x1b9   :  { %v2003_v25 = vpop.f32.mrf.mxu1 }
 0x1ba   :  { %v972_v26 = vsel %vm269_vm2, %v2003_v25, -inf }
 0x1bb   :  { %973 = vmax.xlane.f32.xlu0 %v972_v26 }
 0x1be   :  { %v2007_v29 = vpop.f32.mrf.mxu2 }
 0x1bf   :  { %v689_v30 = vsel %vm269_vm2, %v2007_v29, -inf }
 0x1c0   :  { %690 = vmax.xlane.f32.xlu2 %v689_v30 }
 0x1c6   :  { %v2011_v31 = vpop.f32.mrf.mxu2 }
 0x1c7   :  { %v832_v32 = vsel %vm269_vm2, %v2011_v31, -inf }
 0x1c8   :  { %v2015_v33 = vpop.f32.mrf.mxu1  ;;  %833 = vmax.xlane.f32.xlu1 %v832_v32 }
 0x1c9   :  { %v1115_v34 = vsel %vm269_vm2, %v2015_v33, -inf }
 0x1ca   :  { %1116 = vmax.xlane.f32.xlu2 %v1115_v34 }
 0x1cf   :  { %v2019_v35 = vpop.f32.mrf.mxu2 }
 0x1d0   :  { %v975_v36 = vsel %vm269_vm2, %v2019_v35, -inf  ;;  %v2023_v37 = vpop.f32.mrf.mxu1 }
 0x1d1   :  { %976 = vmax.xlane.f32.xlu1 %v975_v36  ;;  %v1258_v38 = vsel %vm269_vm2, %v2023_v37, -inf }
 0x1d2   :  { %1259 = vmax.xlane.f32.xlu2 %v1258_v38 }
 0x1d7   :  { %v2027_v39 = vpop.f32.mrf.mxu2 }
 0x1d8   :  { %v1118_v40 = vsel %vm269_vm2, %v2027_v39, -inf }
 0x1d9   :  { %1119 = vmax.xlane.f32.xlu1 %v1118_v40 }
 0x1df   :  { %v2031_v41 = vpop.f32.mrf.mxu2 }
 0x1e0   :  { %v1261_v42 = vsel %vm269_vm2, %v2031_v41, -inf }
 0x1e1   :  { %1262 = vmax.xlane.f32.xlu2 %v1261_v42 }
 0x20d   :  { %v400_v44 = vpop.xlane.xlu2 %399 }
 0x20e   :  { %v404_v45 = vsub.f32 %v367_v2, %v400_v44 }
 0x210   :  { %v406_v46 = vmul.f32 1.442695, %v404_v45 }
 0x212   :  { %1544 = vpow2.f32 %v406_v46 }
 0x215   :  { %v545_v48 = vpop.xlane.xlu2 %544 }
 0x216   :  { %v549_v49 = vsub.f32 %v512_v8, %v545_v48 }
 0x218   :  { %v2039_v50 = vpop.eup %1544  ;;  %v551_v51 = vmul.f32 1.442695, %v549_v49 }
 0x219   :  { %v410_v52 = vsel %vm269_vm2, %v2039_v50, 0.0 }
 0x21a   :  { %1546 = vpow2.f32 %v551_v51  ;;  %411 = vadd.xlane.f32.xlu0 %v410_v52 }
 0x21c   :  { %v284_v53 = vpop.xlane.xlu0 %283 }
 0x21d   :  { %1548 = vrcp.f32 %v284_v53  ;;  %v688_v54 = vpop.xlane.xlu2 %687 }
 0x21e   :  { %v403_v55 = vpop.xlane.xlu1 %402  ;;  %v692_v56 = vsub.f32 %v655_v15, %v688_v54 }
 0x21f   :  { %v405_v57 = vsub.f32 %v395_v16, %v403_v55  ;;  %v1520_v16 = vunpack.i.h.bf16 %v1982_v4 }
 0x220   :  { %v2043_v58 = vpop.eup %1546  ;;  %v694_v59 = vmul.f32 1.442695, %v692_v56 }
 0x221   :  { %v408_v60 = vmul.f32 1.442695, %v405_v57  ;;  %v555_v61 = vsel %vm269_vm2, %v2043_v58, 0.0 }
 0x222   :  { %1550 = vpow2.f32 %v694_v59  ;;  %556 = vadd.xlane.f32.xlu0 %v555_v61 }
 0x223   :  { %v1549_v62 = vpop.eup %1548  ;;  %1552 = vpow2.f32 %v408_v60 }
 0x224   :  { %v2048_v63 = vmul.f32 %v1549_v62, %v1985_v12 }
 0x225   :  { %v287_v2 = vpop.xlane.xlu2 %286 }
 0x226   :  { %1439 = vmatmul.msk.f32.vlgmr.msra.gmra.mxu3 %vm269_vm2, %v2048_v63  ;;  %v831_v3 = vpop.xlane.xlu1 %830  ;;  %1554 = vrcp.f32 %v287_v2  ;;  %v548_v6 = vpop.xlane.xlu0 %547 }
 0x227   :  { %588 = vmatpush.msra.mxu3 %v1519_v0  ;;  %v835_v5 = vsub.f32 %v1993_v20, %v831_v3  ;;  %v550_v7 = vsub.f32 %v1995_v21, %v548_v6 }
 0x228   :  { %v2055_v8 = vpop.eup %1550 }
 0x229   :  { %v837_v9 = vmul.f32 1.442695, %v835_v5  ;;  %v2057_v10 = vpop.eup %1552  ;;  %v553_v11 = vmul.f32 1.442695, %v550_v7  ;;  %v698_v12 = vsel %vm269_vm2, %v2055_v8, 0.0 }
 0x22a   :  { %699 = vadd.xlane.f32.xlu2 %v698_v12  ;;  %v413_v13 = vsel %vm269_vm2, %v2057_v10, 0.0 }
 0x22b   :  { %1556 = vpow2.f32 %v837_v9  ;;  %414 = vadd.xlane.f32.xlu0 %v413_v13  ;;  %v1524_v9 = vunpack.i.l.bf16 %v2035_v43 }
 0x22c   :  { %1558 = vpow2.f32 %v553_v11  ;;  %v1555_v14 = vpop.eup %1554 }
 0x22d   :  { %v2064_v15 = vmul.f32 %v1555_v14, %v1991_v19 }
 0x22f   :  { %1440 = vmatmul.msk.f32.vlgmr.msrb.gmra.mxu0 %vm269_vm2, %v2064_v15 }
 0x230   :  { %614 = vmatpush.msrb.mxu0 %v1520_v16  ;;  %v1529_v16 = vunpack.i.l.bf16 %v1979_v1 }
 0x231   :  { %v2069_v17 = vpop.eup %1556 }
 0x232   :  { %v2071_v18 = vpop.eup %1558  ;;  %v841_v20 = vsel %vm269_vm2, %v2069_v17, 0.0 }
 0x233   :  { %842 = vadd.xlane.f32.xlu1 %v841_v20  ;;  %v558_v21 = vsel %vm269_vm2, %v2071_v18, 0.0  ;;  %v691_v22 = vpop.xlane.xlu2 %690 }
 0x234   :  { %559 = vadd.xlane.f32.xlu2 %v558_v21  ;;  %v693_v19 = vsub.f32 %v2007_v29, %v691_v22 }
 0x236   :  { %v696_v4 = vmul.f32 1.442695, %v693_v19 }
 0x238   :  { %1560 = vpow2.f32 %v696_v4  ;;  %v1534_v4 = vunpack.i.l.bf16 %v2037_v47 }
 0x23b   :  { %v834_v23 = vpop.xlane.xlu1 %833 }
 0x23c   :  { %v836_v24 = vsub.f32 %v2011_v31, %v834_v23  ;;  %v1525_v23 = vunpack.i.h.bf16 %v2035_v43 }
 0x23d   :  { %v1117_v26 = vpop.xlane.xlu2 %1116 }
 0x23e   :  { %v2079_v30 = vpop.eup %1560  ;;  %v839_v32 = vmul.f32 1.442695, %v836_v24  ;;  %v1121_v34 = vsub.f32 %v2015_v33, %v1117_v26 }
 0x23f   :  { %v701_v36 = vsel %vm269_vm2, %v2079_v30, 0.0 }
 0x240   :  { %1562 = vpow2.f32 %v839_v32  ;;  %702 = vadd.xlane.f32.xlu0 %v701_v36  ;;  %v1123_v38 = vmul.f32 1.442695, %v1121_v34  ;;  %v1530_v36 = vunpack.i.h.bf16 %v1979_v1 }
 0x242   :  { %1564 = vpow2.f32 %v1123_v38 }
 0x244   :  { %v977_v40 = vpop.xlane.xlu1 %976 }
 0x245   :  { %v979_v29 = vsub.f32 %v2019_v35, %v977_v40  ;;  %v1260_v52 = vpop.xlane.xlu2 %1259 }
 0x246   :  { %v2084_v42 = vpop.eup %1562  ;;  %v1264_v60 = vsub.f32 %v2023_v37, %v1260_v52 }
 0x247   :  { %v844_v31 = vsel %vm269_vm2, %v2084_v42, 0.0  ;;  %v982_v44 = vmul.f32 1.442695, %v979_v29 }
 0x248   :  { %845 = vadd.xlane.f32.xlu0 %v844_v31  ;;  %v2093_v33 = vpop.eup %1564  ;;  %v1266_v61 = vmul.f32 1.442695, %v1264_v60 }
 0x249   :  { %1566 = vpow2.f32 %v982_v44  ;;  %v1127_v35 = vsel %vm269_vm2, %v2093_v33, 0.0 }
 0x24c   :  { %v1120_v45 = vpop.xlane.xlu1 %1119  ;;  %1282 = vrot.lane.b32.xlu2 %v1923_v27, %s1795_s6  ;;  %1139 = vrot.lane.b32.xlu1 %v1923_v27, %s1794_s26  ;;  %v974_v27 = vpop.xlane.xlu0 %973 }
 0x24d   :  { %v1122_v46 = vsub.f32 %v2027_v39, %v1120_v45  ;;  %v978_v55 = vsub.f32 %v2003_v25, %v974_v27 }
 0x24f   :  { %v1125_v48 = vmul.f32 1.442695, %v1122_v46  ;;  %v2098_v49 = vpop.eup %1566  ;;  %v980_v57 = vmul.f32 1.442695, %v978_v55 }
 0x250   :  { %1128 = vadd.xlane.f32.xlu0 %v1127_v35  ;;  %v987_v51 = vsel %vm269_vm2, %v2098_v49, 0.0 }
 0x251   :  { %1568 = vpow2.f32 %v1125_v48 }
 0x252   :  { %1570 = vpow2.f32 %v980_v57 }
 0x254   :  { %v1263_v39 = vpop.xlane.xlu2 %1262 }
 0x255   :  { %v1265_v56 = vsub.f32 %v2031_v41, %v1263_v39 }
 0x257   :  { %v2102_v53 = vpop.eup %1568  ;;  %v1268_v59 = vmul.f32 1.442695, %v1265_v56 }
 0x258   :  { %988 = vadd.xlane.f32.xlu0 %v987_v51  ;;  %v1130_v54 = vsel %vm269_vm2, %v2102_v53, 0.0  ;;  %v2109_v62 = vpop.eup %1570 }
 0x259   :  { %1572 = vpow2.f32 %v1268_v59  ;;  %v984_v2 = vsel %vm269_vm2, %v2109_v62, 0.0 }
 0x25a   :  { %1574 = vpow2.f32 %v1266_v61 }
 0x25f   :  { %v2111_v0 = vpop.eup %1572 }
 0x260   :  { %1131 = vadd.xlane.f32.xlu0 %v1130_v54  ;;  %v1273_v25 = vsel %vm269_vm2, %v2111_v0, 0.0  ;;  %v2119_v41 = vpop.eup %1574 }
 0x261   :  { %v1270_v37 = vsel %vm269_vm2, %v2119_v41, 0.0 }
 0x274   :  { %1165 = vrot.lane.b32.xlu0 %v1926_v28, %s1794_s26 }
 0x275   :  { %985 = vadd.xlane.f32.xlu2 %v984_v2 }
 0x276   :  { %1274 = vadd.xlane.f32.xlu1 %v1273_v25 }
 0x27d   :  { %1271 = vadd.xlane.f32.xlu2 %v1270_v37 }
 0x28d   :  { %v412_v3 = vpop.xlane.xlu0 %411 }
 0x28e   :  { %1576 = vrcp.f32 %v412_v3 }
 0x294   :  { %v1577_v5 = vpop.eup %1576 }
 0x295   :  { %1308 = vrot.lane.b32.xlu2 %v1926_v28, %s1795_s6  ;;  %v418_v6 = vmul.f32 %v1577_v5, %v2039_v50  ;;  %v557_v7 = vpop.xlane.xlu0 %556 }
 0x296   :  { %1578 = vrcp.f32 %v557_v7 }
 0x297   :  { %1445 = vmatmul.msk.f32.vlgmr.msrb.gmra.mxu3 %vm269_vm2, %v418_v6  ;;  %v420_v12 = vadd.f32 %v418_v6, %v2048_v63 }
 0x298   :  { %731 = vmatpush.msrb.mxu3 %v1524_v9 }
 0x29c   :  { %v1579_v11 = vpop.eup %1578 }
 0x29d   :  { %v563_v13 = vmul.f32 %v1579_v11, %v2043_v58  ;;  %v700_v14 = vpop.xlane.xlu2 %699 }
 0x29e   :  { %1580 = vrcp.f32 %v700_v14  ;;  %v415_v20 = vpop.xlane.xlu0 %414 }
 0x29f   :  { %v565_v28 = vadd.f32 %v563_v13, %v420_v12  ;;  %1582 = vrcp.f32 %v415_v20  ;;  %1451 = vmatmul.msk.f32.vlgmr.msra.gmra.mxu3 %vm269_vm2, %v563_v13 }
 0x2a0   :  { %874 = vmatpush.msra.mxu3 %v1529_v16 }
 0x2a4   :  { %v1581_v50 = vpop.eup %1580 }
 0x2a5   :  { %v1583_v21 = vpop.eup %1582  ;;  %v706_v22 = vmul.f32 %v1581_v50, %v2055_v8 }
 0x2a6   :  { %v843_v19 = vpop.xlane.xlu1 %842  ;;  %v419_v63 = vmul.f32 %v1583_v21, %v2057_v10 }
 0x2a7   :  { %1584 = vrcp.f32 %v843_v19  ;;  %v560_v58 = vpop.xlane.xlu2 %559  ;;  %v708_v24 = vadd.f32 %v706_v22, %v565_v28  ;;  %1457 = vmatmul.msk.f32.vlgmr.msrb.gmra.mxu3 %vm269_vm2, %v706_v22 }
 0x2a8   :  { %1586 = vrcp.f32 %v560_v58  ;;  %1017 = vmatpush.msrb.mxu3 %v1534_v4  ;;  %1446 = vmatmul.msk.f32.vlgmr.msra.gmra.mxu0 %vm269_vm2, %v419_v63  ;;  %v421_v27 = vadd.f32 %v419_v63, %v2064_v15 }
 0x2a9   :  { %v314_v26 = vpop.f32.mrf.mxu3  ;;  %757 = vmatpush.msra.mxu0 %v1525_v23 }
 0x2aa   :  { %340 = vst.msk [vmem:[#allocation2] sm:$0xff] %vm216_vm1, %v314_v26 }
 0x2ac   :  { %v337_v32 = vpop.f32.mrf.mxu0 }
 0x2ad   :  { %v1585_v8 = vpop.eup %1584  ;;  %341 = vst.msk [vmem:[#allocation2 + $0x8] sm:$0xff] %vm216_vm1, %v337_v32 }
 0x2ae   :  { %v1587_v34 = vpop.eup %1586  ;;  %v849_v10 = vmul.f32 %v1585_v8, %v2069_v17  ;;  %v1535_v17 = vunpack.i.h.bf16 %v2037_v47 }
 0x2af   :  { %v564_v43 = vmul.f32 %v1587_v34, %v2071_v18  ;;  %v1283_v51 = vpop.permute.xlu2 %1282 }
 0x2b0   :  { %v851_v38 = vadd.f32 %v849_v10, %v708_v24  ;;  %1463 = vmatmul.msk.f32.vlgmr.msra.gmra.mxu3 %vm269_vm2, %v849_v10 }
 0x2b1   :  { %1452 = vmatmul.msk.f32.vlgmr.msrb.gmra.mxu0 %vm269_vm2, %v564_v43  ;;  %v566_v55 = vadd.f32 %v564_v43, %v421_v27 }
 0x2b2   :  { %900 = vmatpush.msrb.mxu0 %v1530_v36 }
 0x2b3   :  { %v703_v40 = vpop.xlane.xlu0 %702 }
 0x2b4   :  { %1588 = vrcp.f32 %v703_v40  ;;  %v1349_v40 = vld [vmem:[#allocation11 + $0x10] sm:$0xff] }
 0x2ba   :  { %v1589_v29 = vpop.eup %1588 }
 0x2bb   :  { %v707_v31 = vmul.f32 %v1589_v29, %v2079_v30  ;;  %v846_v44 = vpop.xlane.xlu0 %845  ;;  %v1348_v29 = vld [vmem:[#allocation11 + $0x8] sm:$0xff] }
 0x2bc   :  { %1590 = vrcp.f32 %v846_v44 }
 0x2bd   :  { %1458 = vmatmul.msk.f32.vlgmr.msra.gmra.mxu0 %vm269_vm2, %v707_v31 }
 0x2be   :  { %v1140_v18 = vpop.permute.xlu1 %1139  ;;  %1043 = vmatpush.msra.mxu0 %v1535_v17 }
 0x2bf   :  { %1160 = vmatpush.msra.mxu3 %v1140_v18 }
 0x2c2   :  { %v1591_v1 = vpop.eup %1590 }
 0x2c3   :  { %v850_v45 = vmul.f32 %v1591_v1, %v2084_v42  ;;  %v1129_v46 = vpop.xlane.xlu0 %1128 }
 0x2c5   :  { %1464 = vmatmul.msk.f32.vlgmr.msrb.gmra.mxu0 %vm269_vm2, %v850_v45 }
 0x2cb   :  { %v989_v35 = vpop.xlane.xlu0 %988 }
 0x2cc   :  { %1592 = vrcp.f32 %v989_v35 }
 0x2d2   :  { %v1593_v48 = vpop.eup %1592 }
 0x2d3   :  { %v993_v30 = vmul.f32 %v1593_v48, %v2098_v49  ;;  %v1132_v47 = vpop.xlane.xlu0 %1131  ;;  %v709_v49 = vadd.f32 %v707_v31, %v566_v55  ;;  %v1347_v31 = vld [vmem:[#allocation11] sm:$0xff] }
 0x2d4   :  { %1594 = vrcp.f32 %v1132_v47 }
 0x2d5   :  { %1470 = vmatmul.msk.f32.vlgmr.msra.gmra.mxu0 %vm269_vm2, %v993_v30  ;;  %v852_v57 = vadd.f32 %v850_v45, %v709_v49 }
 0x2d7   :  { %v995_v60 = vadd.f32 %v993_v30, %v852_v57  ;;  %v1539_v30 = vld [vmem:[%s2194_s8] ss:$0 sm:$0xff] }
 0x2da   :  { %v1595_v52 = vpop.eup %1594 }
 0x2db   :  { %v1136_v54 = vmul.f32 %v1595_v52, %v2102_v53 }
 0x2dd   :  { %v1138_v25 = vadd.f32 %v1136_v54, %v995_v60 }
 0x2e6   :  { %v1166_v39 = vpop.permute.xlu0 %1165 }
 0x2e7   :  { %1186 = vmatpush.msrb.mxu0 %v1166_v39 }
 0x2e8   :  { %v986_v42 = vpop.xlane.xlu2 %985  ;;  %1476 = vmatmul.msk.f32.vlgmr.msrb.gmra.mxu0 %vm269_vm2, %v1136_v54 }
 0x2e9   :  { %1596 = vrcp.f32 %v986_v42  ;;  %v1275_v56 = vpop.xlane.xlu1 %1274 }
 0x2ea   :  { %1598 = vrcp.f32 %v1275_v56 }
 0x2eb   :  { %1600 = vrcp.f32 %v1129_v46 }
 0x2ef   :  { %v1597_v59 = vpop.eup %1596 }
 0x2f0   :  { %v1599_v61 = vpop.eup %1598  ;;  %v992_v2 = vmul.f32 %v1597_v59, %v2109_v62  ;;  %v1272_v15 = vpop.xlane.xlu2 %1271 }
 0x2f1   :  { %v1279_v53 = vmul.f32 %v1599_v61, %v2111_v0  ;;  %1602 = vrcp.f32 %v1272_v15  ;;  %v1601_v37 = vpop.eup %1600 }
 0x2f2   :  { %1469 = vmatmul.msk.f32.vlgmr.msrb.gmra.mxu3 %vm269_vm2, %v992_v2  ;;  %v994_v5 = vadd.f32 %v992_v2, %v851_v38  ;;  %v1135_v7 = vmul.f32 %v1601_v37, %v2093_v33  ;;  %v1350_v38 = vld [vmem:[#allocation11 + $0x18] sm:$0xff] }
 0x2f3   :  { %v1281_v3 = vadd.f32 %v1279_v53, %v1138_v25  ;;  %1303 = vmatpush.msrb.mxu3 %v1283_v51  ;;  %1373 = vmatpush.msra.mxu1 %v1350_v38 }
 0x2f4   :  { %v1137_v11 = vadd.f32 %v1135_v7, %v994_v5 }
 0x2f5   :  { %v1387_v6 = vmul.f32 0.125, %v1281_v3  ;;  %1374 = vmatpush.msra.mxu1 %v1349_v40 }
 0x2f7   :  { %v1603_v9 = vpop.eup %1602  ;;  %1389 = vst.msk [vmem:[#allocation13 + $0x8] sm:$0xff] %vm269_vm2, %v1387_v6  ;;  %1375 = vmatpush.msra.mxu1 %v1348_v29 }
 0x2f8   :  { %v1278_v62 = vmul.f32 %v1603_v9, %v2119_v41  ;;  %v1309_v12 = vpop.permute.xlu2 %1308 }
 0x2f9   :  { %1329 = vmatpush.msra.mxu0 %v1309_v12  ;;  %1376 = vmatpush.msra.mxu1 %v1347_v31 }
 0x2fa   :  { %v1280_v13 = vadd.f32 %v1278_v62, %v1137_v11  ;;  %1475 = vmatmul.msk.f32.vlgmr.msra.gmra.mxu3 %vm269_vm2, %v1135_v7  ;;  %1482 = vmatmul.msk.f32.vlgmr.msra.gmra.mxu0 %vm269_vm2, %v1279_v53 }
 0x2fc   :  { %v1386_v0 = vmul.f32 0.125, %v1280_v13 }
 0x2fe   :  { %1388 = vst.msk [vmem:[#allocation13] sm:$0xff] %vm269_vm2, %v1386_v0 }
 0x2ff   :  { %1415 = dma.vmem_to_hbm [thread:$0]  %s1408_s0, 256, %s1410_s14, [#allocation14], %s1783_s21, %s1783_s21, %s1784_s22  }
 0x302   :  { %1481 = vmatmul.msk.f32.vlgmr.msrb.gmra.mxu3 %vm269_vm2, %v1278_v62 }
 0x31a   :  { %v446_v14 = vpop.f32.mrf.mxu3 }
 0x31b   :  { %478 = vrot.lane.b32.xlu0 %v446_v14, %s1796_s1 }
 0x322   :  { %v590_v33 = vpop.f32.mrf.mxu3 }
 0x323   :  { %621 = vrot.lane.b32.xlu2 %v590_v33, %s1784_s22 }
 0x325   :  { %v473_v16 = vpop.f32.mrf.mxu0 }
 0x326   :  { %480 = vrot.lane.b32.xlu0 %v473_v16, %s1796_s1 }
 0x32a   :  { %v733_v41 = vpop.f32.mrf.mxu3 }
 0x32e   :  { %v616_v20 = vpop.f32.mrf.mxu0  ;;  %764 = vrot.lane.b32.xlu0 %v733_v41, %s1797_s3 }
 0x32f   :  { %623 = vrot.lane.b32.xlu2 %v616_v20, %s1784_s22 }
 0x333   :  { %v876_v28 = vpop.f32.mrf.mxu3 }
 0x337   :  { %907 = vrot.lane.b32.xlu2 %v876_v28, %s1798_s27 }
 0x33a   :  { %v759_v50 = vpop.f32.mrf.mxu0 }
 0x33b   :  { %766 = vrot.lane.b32.xlu0 %v759_v50, %s1797_s3 }
 0x342   :  { %v902_v21 = vpop.f32.mrf.mxu0 }
 0x343   :  { %909 = vrot.lane.b32.xlu2 %v902_v21, %s1798_s27 }
 0x352   :  { %v1045_v19 = vpop.f32.mrf.mxu0 }
 0x365   :  { %v1188_v63 = vpop.f32.mrf.mxu0 }
 0x375   :  { %v1019_v22 = vpop.f32.mrf.mxu3 }
 0x376   :  { %1050 = vrot.lane.b32.xlu0 %v1019_v22, %s1799_s28 }
 0x377   :  { %v1331_v23 = vpop.f32.mrf.mxu0 }
 0x37d   :  { %v1162_v4 = vpop.f32.mrf.mxu3  ;;  %v622_v26 = vpop.permute.xlu2 %621 }
 0x37e   :  { %1193 = vrot.lane.b32.xlu1 %v1162_v4, %s1800_s29  ;;  %1052 = vrot.lane.b32.xlu0 %v1045_v19, %s1799_s28 }
 0x385   :  { %v1305_v58 = vpop.f32.mrf.mxu3 }
 0x386   :  { %1336 = vrot.lane.b32.xlu2 %v1305_v58, %s1801_s30  ;;  %1195 = vrot.lane.b32.xlu1 %v1188_v63, %s1800_s29 }
 0x389   :  { %v624_v8 = vpop.permute.xlu2 %623 }
 0x38d   :  { %v479_v24 = vpop.permute.xlu0 %478 }
 0x38e   :  { %1338 = vrot.lane.b32.xlu2 %v1331_v23, %s1801_s30  ;;  %485 = vst.msk [vmem:[#allocation2] sm:$0xff] %vm484_vm3, %v479_v24 }
 0x38f   :  { %628 = vst.msk [vmem:[#allocation2] sm:$0xff] %vm627_vm4, %v622_v26 }
 0x391   :  { %v908_v10 = vpop.permute.xlu2 %907 }
 0x398   :  { %v481_v32 = vpop.permute.xlu0 %480 }
 0x399   :  { %486 = vst.msk [vmem:[#allocation2 + $0x8] sm:$0xff] %vm484_vm3, %v481_v32 }
 0x39a   :  { %629 = vst.msk [vmem:[#allocation2 + $0x8] sm:$0xff] %vm627_vm4, %v624_v8 }
 0x39d   :  { %v910_v36 = vpop.permute.xlu2 %909 }
 0x3a0   :  { %v765_v34 = vpop.permute.xlu0 %764 }
 0x3a1   :  { %771 = vst.msk [vmem:[#allocation2] sm:$0xff] %vm770_vm5, %v765_v34 }
 0x3a2   :  { %914 = vst.msk [vmem:[#allocation2] sm:$0xff] %vm913_vm6, %v908_v10 }
 0x3ad   :  { %v767_v43 = vpop.permute.xlu0 %766 }
 0x3ae   :  { %772 = vst.msk [vmem:[#allocation2 + $0x8] sm:$0xff] %vm770_vm5, %v767_v43 }
 0x3af   :  { %915 = vst.msk [vmem:[#allocation2 + $0x8] sm:$0xff] %vm913_vm6, %v910_v36 }
 0x3e0   :  { %v1337_v17 = vpop.permute.xlu2 %1336 }
 0x3e8   :  { %v1051_v44 = vpop.permute.xlu0 %1050  ;;  %v1339_v46 = vpop.permute.xlu2 %1338 }
 0x3e9   :  { %1057 = vst.msk [vmem:[#allocation2] sm:$0xff] %vm1056_vm7, %v1051_v44 }
 0x3f0   :  { %v1194_v18 = vpop.permute.xlu1 %1193  ;;  %v1053_v1 = vpop.permute.xlu0 %1052 }
 0x3f1   :  { %1200 = vst.msk [vmem:[#allocation2] sm:$0xff] %vm1199_vm8, %v1194_v18 }
 0x3f2   :  { %1343 = vst.msk [vmem:[#allocation2] sm:$0xff] %vm1342_vm9, %v1337_v17 }
 0x3f3   :  { %1058 = vst.msk [vmem:[#allocation2 + $0x8] sm:$0xff] %vm1056_vm7, %v1053_v1 }
 0x3f8   :  { %v1196_v45 = vpop.permute.xlu1 %1195 }
 0x3f9   :  { %1201 = vst.msk [vmem:[#allocation2 + $0x8] sm:$0xff] %vm1199_vm8, %v1196_v45  ;;  %v1345_v35 = vld [vmem:[#allocation2] sm:$0xff] }
 0x3fa   :  { %1344 = vst.msk [vmem:[#allocation2 + $0x8] sm:$0xff] %vm1342_vm9, %v1339_v46  ;;  %1483 = vmatmul.msk.f32.vlgmr.msra.gmra.mxu1 %vm124_vm0, %v1345_v35 }
 0x401   :  { %v1346_v48 = vld [vmem:[#allocation2 + $0x8] sm:$0xff] }
 0x402   :  { %1484 = vmatmul.msk.f32.gmra.mxu1 %vm124_vm0, %v1346_v48 }
 0x477   :  { %v1378_v47 = vpop.f32.mrf.mxu1 }
 0x478   :  { %v1379_v51 = vadd.f32 %v1539_v30, %v1378_v47 }
 0x47a   :  { %1384 = vst.msk [vmem:[#allocation12] sm:$0xff] %vm124_vm0, %v1379_v51 }
 0x47f   :  { %v1381_v52 = vpop.f32.mrf.mxu1 }
 0x480   :  { %v1382_v27 = vadd.f32 %v1539_v30, %v1381_v52 }
 0x482   :  { %1385 = vst.msk [vmem:[#allocation12 + $0x8] sm:$0xff] %vm124_vm0, %v1382_v27 }
 0x483   :  { %1402 = dma.vmem_to_hbm [thread:$0]  %s1395_s16, 256, %s1397_s10, [#allocation5], %s1783_s21, %s1783_s21, %s1784_s22  }
 0x484   :  { %1778 = dma.done.wait [#allocation5], 256  }
 0x485   :  { %1779 = vsyncadd [#allocation5], 4294967040 }
 0x486   :  { %1780 = dma.done.wait [#allocation14], 256  }
 0x487   :  { %1781 = vsyncadd [#allocation14], 4294967040 }
 0x488   :  { %1424 = vsyncpa [#allocation4], 1 }
 0x489   :  { %1425 = vsyncpa [#allocation7], 1 }
 0x48a   :  { %1426 = vsyncpa [#allocation10], 1 }
 0x48b   :  { %1427 = vsyncpa [#allocation5], 1 }
 0x48c   :  { %1428 = vsyncpa [#allocation14], 1 }

</bundles_post_ra>
